<compile_context>
chip_gen: v7x
topology: tpu7x:2x2x1
jax: 0.10.0
libtpu: 0.0.40
codegen_flags: <defaults>
</compile_context>

<pallas_src>
import functools

import jax
import jax.numpy as jnp
from jax.experimental import pallas as pl
from jax.experimental.pallas import tpu as pltpu


# ----------------------------------------------------------------------------
# Fused Pallas kernel (Bt batch elements per grid step)
# ----------------------------------------------------------------------------

def centering_attention_kernel(x_ref, wq_ref, bq_ref, wk_ref, bk_ref,
                               wv_ref, bv_ref, o_ref, *, tq):
    """x_ref/o_ref: (Bt, C, HW); weights (Cout, C); biases (Cout, 1)."""
    bt, _, hw = x_ref.shape
    n_q_tiles = hw // tq

    # Hoist weights / biases once per grid step (reused for all Bt elements).
    wq = wq_ref[...]
    bq = bq_ref[...]
    wk = wk_ref[...]
    bk = bk_ref[...]
    wv = wv_ref[...]
    bv = bv_ref[...]

    def batch_body(b, carry):
        x = x_ref[b]                                                  # (C, HW)

        # 1x1 convs as (Cout, C) @ (C, HW) — HW on the lane dim.
        k = jnp.dot(wk, x, preferred_element_type=jnp.float32) + bk  # (Cq, HW)
        v = jnp.dot(wv, x, preferred_element_type=jnp.float32) + bv  # (C, HW)
        # Transpose the *small* V once (C rows -> a few vregs of XLU traffic)
        # so the big exp matrix feeds the MXU untransposed below.
        v_t = v.T                                                     # (HW, C)

        def q_tile_body(t, inner_carry):
            i0 = pl.multiple_of(t * tq, tq)
            x_q = x_ref[b, :, pl.ds(i0, tq)]                          # (C, tq)
            q_t = (jnp.dot(wq, x_q, preferred_element_type=jnp.float32)
                   + bq)                                              # (Cq, tq)

            # scores for tq query rows: s[i, j] = sum_c q[c, i] * k[c, j]
            s = jax.lax.dot_general(q_t, k, (((0,), (0,)), ((), ())),
                                    preferred_element_type=jnp.float32)  # (tq, HW)
            s = s - jnp.max(s, axis=-1, keepdims=True)
            e = jnp.exp(s)                                            # (tq, HW)
            l = jnp.sum(e, axis=-1, keepdims=True)                    # (tq, 1)

            # Unnormalized aggregation (standard contraction — the big e
            # matrix is the untransposed MXU operand), then fold the softmax
            # normalization into a tiny per-row scale.
            o_t = jnp.dot(e, v_t, preferred_element_type=jnp.float32)  # (tq, C)
            # Exact divide on (tq, 1) only; pl.reciprocal(approx=True) would
            # be marginally cheaper but risks the 1e-4 tolerance.
            o_t = o_t * (1.0 / l)

            # residual add + lane-dense store of one (C, tq) column block
            o_ref[b, :, pl.ds(i0, tq)] = o_t.T + x_q
            return inner_carry

        jax.lax.fori_loop(0, n_q_tiles, q_tile_body, None, unroll=True)
        return carry

    jax.lax.fori_loop(0, bt, batch_body, None, unroll=True)


# ----------------------------------------------------------------------------
# Wrapper
# ----------------------------------------------------------------------------

def _pick_block_batch(batch):
    """Largest Bt <= 8 dividing batch while keeping the grid length >= 2
    (so v7x's two TensorCores both get work); Bt > 1 amortizes per-step
    overhead on larger batches."""
    best = 1
    for bt in range(1, min(8, batch) + 1):
        if batch % bt == 0 and (batch // bt >= 2 or batch == 1):
            best = bt
    return best


@functools.partial(jax.jit, static_argnames=("block_batch", "tq"))
def centering_attention(x, wq, bq, wk, bk, wv, bv, *, block_batch=None, tq=None):
    B, C, H, W = x.shape
    HW = H * W
    # NCHW is already (C, H*W)-contiguous per batch: this reshape is free.
    x2 = x.reshape(B, C, HW)

    if tq is None:
        tq = 128 if HW % 128 == 0 else HW      # lane-dense query-row tiles
    if block_batch is None:
        block_batch = _pick_block_batch(B)
    grid = (B // block_batch,)

    x_spec = pl.BlockSpec((block_batch, C, HW), lambda g: (g, 0, 0))

    def full_spec(shape):
        nd = len(shape)
        return pl.BlockSpec(tuple(shape), lambda g, nd=nd: (0,) * nd)

    kernel = functools.partial(centering_attention_kernel, tq=tq)

    out = pl.pallas_call(
        kernel,
        grid=grid,
        in_specs=[x_spec,
                  full_spec(wq.shape), full_spec(bq.shape),
                  full_spec(wk.shape), full_spec(bk.shape),
                  full_spec(wv.shape), full_spec(bv.shape)],
        out_specs=x_spec,
        out_shape=jax.ShapeDtypeStruct((B, C, HW), jnp.float32),
        compiler_params=pltpu.CompilerParams(
            dimension_semantics=("parallel",)),
    )(x2, wq, bq, wk, bk, wv, bv)

    return out.reshape(B, C, H, W)


# ----------------------------------------------------------------------------
# Pure-JAX reference (mirrors the PyTorch forward) for a correctness check
# ----------------------------------------------------------------------------

def centering_attention_ref(x, wq, bq, wk, bk, wv, bv):
    B, C, H, W = x.shape
    HW = H * W
    xf = x.reshape(B, C, HW)
    q = jnp.einsum('oc,bci->boi', wq, xf) + bq[None]
    k = jnp.einsum('oc,bci->boi', wk, xf) + bk[None]
    v = jnp.einsum('oc,bci->boi', wv, xf) + bv[None]
    att = jax.nn.softmax(jnp.einsum('bci,bcj->bij', q, k), axis=-1)
    out = jnp.einsum('bcj,bij->bci', v, att)
    return (out + xf).reshape(B, C, H, W)


# ----------------------------------------------------------------------------

if __name__ == "__main__":
    key = jax.random.PRNGKey(0)
    kx, k1, k2, k3, k4, k5, k6 = jax.random.split(key, 7)

    # channels must be >= 8 so that channels // 8 >= 1 (as the PyTorch module requires)
    B, C, H, W = 2, 32, 16, 16
    Cq = C // 8

    x = jax.random.normal(kx, (B, C, H, W), dtype=jnp.float32)
    wq = 0.1 * jax.random.normal(k1, (Cq, C), dtype=jnp.float32)
    bq = 0.1 * jax.random.normal(k2, (Cq, 1), dtype=jnp.float32)
    wk = 0.1 * jax.random.normal(k3, (Cq, C), dtype=jnp.float32)
    bk = 0.1 * jax.random.normal(k4, (Cq, 1), dtype=jnp.float32)
    wv = 0.1 * jax.random.normal(k5, (C, C), dtype=jnp.float32)
    bv = 0.1 * jax.random.normal(k6, (C, 1), dtype=jnp.float32)

    out = centering_attention(x, wq, bq, wk, bk, wv, bv)
    out = jax.block_until_ready(out)

    assert out.shape == (B, C, H, W), out.shape
    assert bool(jnp.all(jnp.isfinite(out)))

    ref = centering_attention_ref(x, wq, bq, wk, bk, wv, bv)
    max_err = float(jnp.max(jnp.abs(out - ref)))
    assert jnp.allclose(out, ref, atol=1e-4, rtol=1e-4), max_err

    print("KERNEL_OK")
</pallas_src>

<mosaic_0001>
module attributes {stable_mosaic.version = 11 : i64} {
  func.func @centering_attention_kernel(%arg0: i32, %arg1: memref<1x32x256xf32, #tpu.memory_space<vmem>>, %arg2: memref<4x32xf32, #tpu.memory_space<vmem>>, %arg3: memref<4x1xf32, #tpu.memory_space<vmem>>, %arg4: memref<4x32xf32, #tpu.memory_space<vmem>>, %arg5: memref<4x1xf32, #tpu.memory_space<vmem>>, %arg6: memref<32x32xf32, #tpu.memory_space<vmem>>, %arg7: memref<32x1xf32, #tpu.memory_space<vmem>>, %arg8: memref<1x32x256xf32, #tpu.memory_space<vmem>>) attributes {dimension_semantics = [#tpu.dimension_semantics<parallel>], iteration_bounds = array<i64: 2>, scalar_prefetch = 0 : i64, scratch_operands = 0 : i64, tpu.core_type = #tpu.core_type<tc>, window_params = [{transform_indices = @transform_0, window_bounds = array<i64: 1, 32, 256>}, {pipeline_mode = #tpu.pipeline_mode<synchronous>, transform_indices = @transform_1, window_bounds = array<i64: 4, 32>}, {pipeline_mode = #tpu.pipeline_mode<synchronous>, transform_indices = @transform_2, window_bounds = array<i64: 4, 1>}, {pipeline_mode = #tpu.pipeline_mode<synchronous>, transform_indices = @transform_3, window_bounds = array<i64: 4, 32>}, {pipeline_mode = #tpu.pipeline_mode<synchronous>, transform_indices = @transform_4, window_bounds = array<i64: 4, 1>}, {pipeline_mode = #tpu.pipeline_mode<synchronous>, transform_indices = @transform_5, window_bounds = array<i64: 32, 32>}, {pipeline_mode = #tpu.pipeline_mode<synchronous>, transform_indices = @transform_6, window_bounds = array<i64: 32, 1>}, {transform_indices = @transform_7, window_bounds = array<i64: 1, 32, 256>}]} {
    %c0 = arith.constant 0 : index
    %c0_0 = arith.constant 0 : index
    %0 = vector.load %arg2[%c0, %c0_0] : memref<4x32xf32, #tpu.memory_space<vmem>>, vector<4x32xf32>
    %c0_1 = arith.constant 0 : index
    %c0_2 = arith.constant 0 : index
    %1 = vector.load %arg3[%c0_1, %c0_2] : memref<4x1xf32, #tpu.memory_space<vmem>>, vector<4x1xf32>
    %c0_3 = arith.constant 0 : index
    %c0_4 = arith.constant 0 : index
    %2 = vector.load %arg4[%c0_3, %c0_4] : memref<4x32xf32, #tpu.memory_space<vmem>>, vector<4x32xf32>
    %c0_5 = arith.constant 0 : index
    %c0_6 = arith.constant 0 : index
    %3 = vector.load %arg5[%c0_5, %c0_6] : memref<4x1xf32, #tpu.memory_space<vmem>>, vector<4x1xf32>
    %c0_7 = arith.constant 0 : index
    %c0_8 = arith.constant 0 : index
    %4 = vector.load %arg6[%c0_7, %c0_8] : memref<32x32xf32, #tpu.memory_space<vmem>>, vector<32x32xf32>
    %c0_9 = arith.constant 0 : index
    %c0_10 = arith.constant 0 : index
    %5 = vector.load %arg7[%c0_9, %c0_10] : memref<32x1xf32, #tpu.memory_space<vmem>>, vector<32x1xf32>
    %c0_i32 = arith.constant 0 : i32
    %6 = arith.index_cast %c0_i32 : i32 to index
    %c0_11 = arith.constant 0 : index
    %c0_12 = arith.constant 0 : index
    %7 = vector.load %arg1[%6, %c0_11, %c0_12] : memref<1x32x256xf32, #tpu.memory_space<vmem>>, vector<1x32x256xf32>
    %8 = vector.shape_cast %7 : vector<1x32x256xf32> to vector<32x256xf32>
    %cst = arith.constant dense<0.000000e+00> : vector<4x256xf32>
    %9 = tpu.matmul %2, %8, %cst {dimension_numbers = #tpu.dot_dimension_numbers<[1], [0], [0], [1], [0, 0, 1, 1], [], []>} : vector<4x32xf32>, vector<32x256xf32>, vector<4x256xf32> -> vector<4x256xf32>
    %10 = vector.broadcast %3 : vector<4x1xf32> to vector<4x256xf32>
    %11 = arith.addf %9, %10 : vector<4x256xf32>
    %cst_13 = arith.constant dense<0.000000e+00> : vector<32x256xf32>
    %12 = tpu.matmul %4, %8, %cst_13 {dimension_numbers = #tpu.dot_dimension_numbers<[1], [0], [0], [1], [0, 0, 1, 1], [], []>} : vector<32x32xf32>, vector<32x256xf32>, vector<32x256xf32> -> vector<32x256xf32>
    %13 = vector.broadcast %5 : vector<32x1xf32> to vector<32x256xf32>
    %14 = arith.addf %12, %13 : vector<32x256xf32>
    %15 = tpu.transpose %14, [1, 0] : vector<32x256xf32> -> vector<256x32xf32>
    %c0_i32_14 = arith.constant 0 : i32
    %c128_i32 = arith.constant 128 : i32
    %16 = arith.muli %c0_i32_14, %c128_i32 : i32
    %17 = tpu.assume_multiple %16, 128 : i32
    %18 = arith.index_cast %c0_i32 : i32 to index
    %c0_15 = arith.constant 0 : index
    %19 = arith.index_cast %17 : i32 to index
    %20 = vector.load %arg1[%18, %c0_15, %19] : memref<1x32x256xf32, #tpu.memory_space<vmem>>, vector<1x32x128xf32>
    %21 = vector.shape_cast %20 : vector<1x32x128xf32> to vector<32x128xf32>
    %cst_16 = arith.constant dense<0.000000e+00> : vector<4x128xf32>
    %22 = tpu.matmul %0, %21, %cst_16 {dimension_numbers = #tpu.dot_dimension_numbers<[1], [0], [0], [1], [0, 0, 1, 1], [], []>} : vector<4x32xf32>, vector<32x128xf32>, vector<4x128xf32> -> vector<4x128xf32>
    %23 = vector.broadcast %1 : vector<4x1xf32> to vector<4x128xf32>
    %24 = arith.addf %22, %23 : vector<4x128xf32>
    %cst_17 = arith.constant dense<0.000000e+00> : vector<128x256xf32>
    %25 = tpu.matmul %24, %11, %cst_17 {dimension_numbers = #tpu.dot_dimension_numbers<[0], [0], [1], [1], [0, 1, 1, 1], [], []>} : vector<4x128xf32>, vector<4x256xf32>, vector<128x256xf32> -> vector<128x256xf32>
    %cst_18 = arith.constant dense<0xFF800000> : vector<128xf32>
    %26 = vector.multi_reduction <maximumf>, %25, %cst_18 [1] : vector<128x256xf32> to vector<128xf32>
    %27 = vector.shape_cast %26 : vector<128xf32> to vector<128x1xf32>
    %28 = vector.broadcast %27 : vector<128x1xf32> to vector<128x256xf32>
    %29 = arith.subf %25, %28 : vector<128x256xf32>
    %30 = math.exp %29 : vector<128x256xf32>
    %cst_19 = arith.constant dense<0.000000e+00> : vector<128xf32>
    %31 = vector.multi_reduction <add>, %30, %cst_19 [1] : vector<128x256xf32> to vector<128xf32>
    %32 = vector.shape_cast %31 : vector<128xf32> to vector<128x1xf32>
    %cst_20 = arith.constant dense<0.000000e+00> : vector<128x32xf32>
    %33 = tpu.matmul %30, %15, %cst_20 {dimension_numbers = #tpu.dot_dimension_numbers<[1], [0], [0], [1], [0, 0, 1, 1], [], []>} : vector<128x256xf32>, vector<256x32xf32>, vector<128x32xf32> -> vector<128x32xf32>
    %cst_21 = arith.constant 1.000000e+00 : f32
    %34 = vector.broadcast %cst_21 : f32 to vector<128x1xf32>
    %35 = arith.divf %34, %32 : vector<128x1xf32>
    %36 = vector.broadcast %35 : vector<128x1xf32> to vector<128x32xf32>
    %37 = arith.mulf %33, %36 : vector<128x32xf32>
    %38 = tpu.transpose %37, [1, 0] : vector<128x32xf32> -> vector<32x128xf32>
    %39 = arith.addf %38, %21 : vector<32x128xf32>
    %40 = arith.index_cast %c0_i32 : i32 to index
    %c0_22 = arith.constant 0 : index
    %41 = arith.index_cast %17 : i32 to index
    %42 = vector.load %arg8[%40, %c0_22, %41] : memref<1x32x256xf32, #tpu.memory_space<vmem>>, vector<1x32x128xf32>
    %43 = vector.shape_cast %42 : vector<1x32x128xf32> to vector<32x128xf32>
    %44 = vector.shape_cast %39 : vector<32x128xf32> to vector<1x32x128xf32>
    tpu.vector_store %arg8[%40, %c0_22, %41], %44 {strides = array<i32>} : memref<1x32x256xf32, #tpu.memory_space<vmem>>, vector<1x32x128xf32>,
    %c1_i32 = arith.constant 1 : i32
    %c128_i32_23 = arith.constant 128 : i32
    %45 = arith.muli %c1_i32, %c128_i32_23 : i32
    %46 = tpu.assume_multiple %45, 128 : i32
    %47 = arith.index_cast %c0_i32 : i32 to index
    %c0_24 = arith.constant 0 : index
    %48 = arith.index_cast %46 : i32 to index
    %49 = vector.load %arg1[%47, %c0_24, %48] : memref<1x32x256xf32, #tpu.memory_space<vmem>>, vector<1x32x128xf32>
    %50 = vector.shape_cast %49 : vector<1x32x128xf32> to vector<32x128xf32>
    %cst_25 = arith.constant dense<0.000000e+00> : vector<4x128xf32>
    %51 = tpu.matmul %0, %50, %cst_25 {dimension_numbers = #tpu.dot_dimension_numbers<[1], [0], [0], [1], [0, 0, 1, 1], [], []>} : vector<4x32xf32>, vector<32x128xf32>, vector<4x128xf32> -> vector<4x128xf32>
    %52 = vector.broadcast %1 : vector<4x1xf32> to vector<4x128xf32>
    %53 = arith.addf %51, %52 : vector<4x128xf32>
    %cst_26 = arith.constant dense<0.000000e+00> : vector<128x256xf32>
    %54 = tpu.matmul %53, %11, %cst_26 {dimension_numbers = #tpu.dot_dimension_numbers<[0], [0], [1], [1], [0, 1, 1, 1], [], []>} : vector<4x128xf32>, vector<4x256xf32>, vector<128x256xf32> -> vector<128x256xf32>
    %cst_27 = arith.constant dense<0xFF800000> : vector<128xf32>
    %55 = vector.multi_reduction <maximumf>, %54, %cst_27 [1] : vector<128x256xf32> to vector<128xf32>
    %56 = vector.shape_cast %55 : vector<128xf32> to vector<128x1xf32>
    %57 = vector.broadcast %56 : vector<128x1xf32> to vector<128x256xf32>
    %58 = arith.subf %54, %57 : vector<128x256xf32>
    %59 = math.exp %58 : vector<128x256xf32>
    %cst_28 = arith.constant dense<0.000000e+00> : vector<128xf32>
    %60 = vector.multi_reduction <add>, %59, %cst_28 [1] : vector<128x256xf32> to vector<128xf32>
    %61 = vector.shape_cast %60 : vector<128xf32> to vector<128x1xf32>
    %cst_29 = arith.constant dense<0.000000e+00> : vector<128x32xf32>
    %62 = tpu.matmul %59, %15, %cst_29 {dimension_numbers = #tpu.dot_dimension_numbers<[1], [0], [0], [1], [0, 0, 1, 1], [], []>} : vector<128x256xf32>, vector<256x32xf32>, vector<128x32xf32> -> vector<128x32xf32>
    %cst_30 = arith.constant 1.000000e+00 : f32
    %63 = vector.broadcast %cst_30 : f32 to vector<128x1xf32>
    %64 = arith.divf %63, %61 : vector<128x1xf32>
    %65 = vector.broadcast %64 : vector<128x1xf32> to vector<128x32xf32>
    %66 = arith.mulf %62, %65 : vector<128x32xf32>
    %67 = tpu.transpose %66, [1, 0] : vector<128x32xf32> -> vector<32x128xf32>
    %68 = arith.addf %67, %50 : vector<32x128xf32>
    %69 = arith.index_cast %c0_i32 : i32 to index
    %c0_31 = arith.constant 0 : index
    %70 = arith.index_cast %46 : i32 to index
    %71 = vector.load %arg8[%69, %c0_31, %70] : memref<1x32x256xf32, #tpu.memory_space<vmem>>, vector<1x32x128xf32>
    %72 = vector.shape_cast %71 : vector<1x32x128xf32> to vector<32x128xf32>
    %73 = vector.shape_cast %68 : vector<32x128xf32> to vector<1x32x128xf32>
    tpu.vector_store %arg8[%69, %c0_31, %70], %73 {strides = array<i32>} : memref<1x32x256xf32, #tpu.memory_space<vmem>>, vector<1x32x128xf32>,
    %c2_i32 = arith.constant 2 : i32
    %c1_i32_32 = arith.constant 1 : i32
    return
  }
  func.func @transform_0(%arg0: i32) -> (i32, i32, i32) {
    %c0_i32 = arith.constant 0 : i32
    %c0_i32_0 = arith.constant 0 : i32
    %c0_i32_1 = arith.constant 0 : i32
    return %arg0, %c0_i32, %c0_i32_0 : i32, i32, i32
  }
  func.func @transform_1(%arg0: i32) -> (i32, i32) {
    %c0_i32 = arith.constant 0 : i32
    %c0_i32_0 = arith.constant 0 : i32
    %c0_i32_1 = arith.constant 0 : i32
    return %c0_i32, %c0_i32_0 : i32, i32
  }
  func.func @transform_2(%arg0: i32) -> (i32, i32) {
    %c0_i32 = arith.constant 0 : i32
    %c0_i32_0 = arith.constant 0 : i32
    %c0_i32_1 = arith.constant 0 : i32
    return %c0_i32, %c0_i32_0 : i32, i32
  }
  func.func @transform_3(%arg0: i32) -> (i32, i32) {
    %c0_i32 = arith.constant 0 : i32
    %c0_i32_0 = arith.constant 0 : i32
    %c0_i32_1 = arith.constant 0 : i32
    return %c0_i32, %c0_i32_0 : i32, i32
  }
  func.func @transform_4(%arg0: i32) -> (i32, i32) {
    %c0_i32 = arith.constant 0 : i32
    %c0_i32_0 = arith.constant 0 : i32
    %c0_i32_1 = arith.constant 0 : i32
    return %c0_i32, %c0_i32_0 : i32, i32
  }
  func.func @transform_5(%arg0: i32) -> (i32, i32) {
    %c0_i32 = arith.constant 0 : i32
    %c0_i32_0 = arith.constant 0 : i32
    %c0_i32_1 = arith.constant 0 : i32
    return %c0_i32, %c0_i32_0 : i32, i32
  }
  func.func @transform_6(%arg0: i32) -> (i32, i32) {
    %c0_i32 = arith.constant 0 : i32
    %c0_i32_0 = arith.constant 0 : i32
    %c0_i32_1 = arith.constant 0 : i32
    return %c0_i32, %c0_i32_0 : i32, i32
  }
  func.func @transform_7(%arg0: i32) -> (i32, i32, i32) {
    %c0_i32 = arith.constant 0 : i32
    %c0_i32_0 = arith.constant 0 : i32
    %c0_i32_1 = arith.constant 0 : i32
    return %arg0, %c0_i32, %c0_i32_0 : i32, i32, i32
  }
}

</mosaic_0001>

<bundles_post_ra>
// kernel: centering_attention.1
= control target key start
LH: loop header
LB: loop body
LE: loop exit
PB: predicated region body
PF: predicated region fallthrough
CT: control target
= control target key end

     0   :  { %s2458_s24 = smov 0   ;;  %s3076_s0 = inlined_call_operand.vmem [shape: f32[2,32,256], index: 0, kind: input, shape index: {}]   ;;  %s3077_s1 = inlined_call_operand.vmem [shape: f32[4,32], index: 1, kind: input, shape index: {}]   ;;  %s3078_s2 = inlined_call_operand.vmem [shape: f32[4,1], index: 2, kind: input, shape index: {}]   ;;  %s3079_s3 = inlined_call_operand.vmem [shape: f32[4,32], index: 3, kind: input, shape index: {}]   ;;  %s3080_s4 = inlined_call_operand.vmem [shape: f32[4,1], index: 4, kind: input, shape index: {}]   ;;  %s3081_s5 = inlined_call_operand.vmem [shape: f32[32,32], index: 5, kind: input, shape index: {}]   ;;  %s3082_s6 = inlined_call_operand.vmem [shape: f32[32,1], index: 6, kind: input, shape index: {}]   ;;  %s3083_s7 = inlined_call_operand.vmem [shape: f32[2,32,256], index: 7, kind: output, shape index: {}]  }
   0x1 LB: > { %s2053_s25 = sadd.s32 4294967295, %s2412_s24   ;;  %p2057_p0 = scmp.ge.s32.totalorder %s2412_s24, 1  ;;  %s2412_s24 = sphi %s2458_s24, %s17_s24  }
   0x2   : > { %p237_p1 = scmp.lt.s32.totalorder %s2412_s24, 3 }
   0x4   : > { %p238_p2 = pnand %p2057_p0, %p237_p1 }
   0x5   : > { %p269_p3 = scmp.lt.s32.totalorder (!%p238_p2), %s2053_s25, 1  ;;  %v3084_v0 = vmov (!%p238_p2), 0.0   ;;  %v280_v1 = vld [vmem:[%s3078_s2] sm:$0xf] (!%p238_p2)  ;;  %v2415_v2 = vmov (!%p238_p2), 0   ;;  %vm304_vm0 = vcmask (!%p238_p2), 261120  }
   0x6   : > { %241 = sbr.rel (%p238_p2) target bundleno = 1518 (0x5ee), region = 48  ;;  %372 = vmatprep.mubr.f32.mxu0 (!%p238_p2), %v3084_v0  ;;  %475 = vmatprep.mubr.f32.mxu1 (!%p238_p2), %v3084_v0  ;;  %v282_v3 = vld [vmem:[%s3080_s4] sm:$0xf] (!%p238_p2)  ;;  %v2416_v17 = vmov (!%p238_p2), 0.0|0.0   ;;  %vm2417_vm1 = vmmov (!%p238_p2), 0   ;;  %vm663_vm2 = vcmask (!%p238_p2), 1043456  }
   0x7   : > { %2205 = vset.pattern.permute.xlu0 (!%p238_p2), %v2415_v2  ;;  %v281_v16 = vld [vmem:[%s3079_s3] sm:$0xf] (!%p238_p2)  ;;  %v284_v29 = vld [vmem:[%s3081_s5 + $0x8] sm:$0xff] (!%p238_p2)  ;;  %v285_v30 = vld [vmem:[%s3081_s5 + $0x10] sm:$0xff] (!%p238_p2)  ;;  %vm614_vm3 = vcmask (!%p238_p2), 31744  }
   0x8   : > { %506 = vperm.xlu0 (!%p238_p2), %2205, %v280_v1   ;;  %v2501_v18 = vld [vmem:[%s3077_s1] sm:$0xf] (!%p238_p2)  ;;  %v286_v31 = vld [vmem:[%s3081_s5 + $0x18] sm:$0xff] (!%p238_p2) }
   0x9   : > { %v283_v28 = vld [vmem:[%s3081_s5] sm:$0xff] (!%p238_p2) }
   0xc   : > { %301 = vperm.xlu0 (!%p238_p2), %2205, %v282_v3  }
   0xd   : > { %s3088_s25 = smov (!%p269_p3, %s2053_s25), 1 }
   0xe   : > { %s2115_s28 = sshll.u32 %s3088_s25, 6 }
   0xf   : > { %s2482_s10 = scalar_lea.vmem %s3076_s0, %s2115_s28  ;;  %s3055_s14 = scalar_lea.vmem %s3083_s7, %s2115_s28 }
  0x10   : > { %v292_v4 = vld [vmem:[%s2482_s10 + $0x8] sm:$0xff]  ;;  %v294_v5 = vld [vmem:[%s2482_s10 + $0x18] sm:$0xff]  ;;  %v291_v6 = vld [vmem:[%s2482_s10] sm:$0xff] }
  0x11   : > { %v2149_v7 = vpack.c.bf16 %v294_v5, %v292_v4  ;;  %v293_v8 = vld [vmem:[%s2482_s10 + $0x10] sm:$0xff]  ;;  %v296_v9 = vld [vmem:[%s2482_s10 + $0x28] sm:$0xff]  ;;  %v298_v10 = vld [vmem:[%s2482_s10 + $0x38] sm:$0xff] }
  0x12   : > { %v2151_v11 = vpack.c.bf16 %v293_v8, %v291_v6  ;;  %v2153_v12 = vpack.c.bf16 %v298_v10, %v296_v9  ;;  %v295_v13 = vld [vmem:[%s2482_s10 + $0x20] sm:$0xff]  ;;  %v297_v14 = vld [vmem:[%s2482_s10 + $0x30] sm:$0xff] }
  0x13   : > { %2150 = vmatprep.subr.bf16.mxu0 %v2149_v7  ;;  %2158 = vmatprep.subr.bf16.mxu1 %v2149_v7  ;;  %v2155_v15 = vpack.c.bf16 %v297_v14, %v295_v13  ;;  %v287_v6 = vld [vmem:[%s3082_s6] sm:$0xff]  ;;  %v288_v13 = vld [vmem:[%s3082_s6 + $0x8] sm:$0xff] }
  0x14   : > { %2152 = vmatpush1.bf16.msra.mxu0 %v2151_v11  ;;  %2160 = vmatpush1.bf16.msra.mxu1 %v2151_v11 }
  0x15   : > { %2154 = vmatprep.subr.bf16.mxu0 %v2153_v12  ;;  %2162 = vmatprep.subr.bf16.mxu1 %v2153_v12 }
  0x18   : > { %2156 = vmatpush1.bf16.msra.mxu0 %v2155_v15  ;;  %2164 = vmatpush1.bf16.msra.mxu1 %v2155_v15 }
  0x19   : > { %2165 = vmatprep.subr.bf16.mxu0 %v2416_v17 }
  0x1b   : > { %2062 = vmatmul.mubr.msk.f32.vlgmr.msra.gmra.mrb[0].mxu0 %vm304_vm0, %v281_v16  ;;  %2063 = vmatmul.mubr.msk.f32.vlgmr.msra.gmra.mrb[0].mxu1 %vm304_vm0, %v283_v28 }
  0x1c   : > { %2167 = vmatpush3.bf16.msra.mxu0 %v2151_v11  ;;  %2135 = vmatprep.mubr.msk.f32.mxu0 %vm2417_vm1, %v3084_v0 }
  0x1d   : > { %2168 = vmatprep.subr.bf16.mxu0 %v2416_v17  ;;  %481 = vmatprep.mubr.f32.mxu1 %v3084_v0 }
  0x1f   : > { %2064 = vmatmul.mubr.msk.f32.gmra.mrb[2].mxu1 %vm304_vm0, %v284_v29 }
  0x20   : > { %2170 = vmatpush3.bf16.msra.mxu0 %v2155_v15  ;;  %487 = vmatprep.mubr.f32.mxu1 %v3084_v0 }
  0x23   : > { %2136 = vmatmul.mubr.msk.f32.vlgmr.msra.gmra.mrb[2].mxu0 %vm304_vm0, %v2501_v18  ;;  %2065 = vmatmul.mubr.msk.f32.gmra.mrb[4].mxu1 %vm304_vm0, %v285_v30 }
  0x24   : > { %734 = vmatprep.mubr.f32.mxu0 %v3084_v0  ;;  %493 = vmatprep.mubr.f32.mxu1 %v3084_v0 }
  0x27   : > { %2066 = vmatmul.mubr.msk.f32.gmra.mrb[6].mxu1 %vm304_vm0, %v286_v31 }
  0x87   : > { %v2506_v19 = vpop.permute.xlu0 %506 }
  0x8b   : > { %v302_v20 = vpop.permute.xlu0 %301 }
  0xee   : > { %v374_v21 = vpop.f32.mrb[0].mxu0 }
  0xef   : > { %v2508_v22 = vadd.f32 %v374_v21, %v302_v20  ;;  %v376_v23 = vpop.f32.mrb[1].mxu0 }
  0xf0   : > { %v377_v24 = vadd.f32 %v376_v23, %v302_v20 }
  0xf2   : > { %2068 = vmatprep.subr.msk.mxu0 %vm663_vm2, %v377_v24 }
  0xf3   : > { %2069 = vmatpush1.msk.msra.mxu0 %vm663_vm2, %v2508_v22 }
  0xf4   : > { %2179 = vmatprep.subr.bf16.mxu0 %v2416_v17 }
  0xf6   : > { %v578_v25 = vpop.f32.mrb[2].mxu0 }
  0xf7   : > { %v2137_v26 = vpop.f32.mrb[3].mxu0  ;;  %v579_v27 = vadd.f32 %v578_v25, %v2506_v19  ;;  %v290_v25 = vld [vmem:[%s3082_s6 + $0x18] sm:$0xff] }
  0xf9   : > { %582 = vxpose.xlu1.b32.start.end [1/1] (short) %v579_v27, 128 }
 0x179   : > { %v598_v32 = vpop.trf.xlu1 }
 0x17a   : > { %2070 = vmatmul.mubr.msk.f32.vlgmr.msra.gmra.mrb[4].mxu0 %vm614_vm3, %v598_v32 }
 0x17b   : > { %2181 = vmatpush3.bf16.msra.mxu0 %v2149_v7  ;;  %740 = vmatprep.mubr.f32.mxu0 %v3084_v0  ;;  %v2617_v7 = vpop.f32.mrb[0].mxu1 }
 0x17c   : > { %2182 = vmatprep.subr.bf16.mxu0 %v2416_v17  ;;  %v2621_v9 = vpop.f32.mrb[1].mxu1 }
 0x17d   : > { %v599_v33 = vpop.trf.xlu1  ;;  %v2625_v11 = vpop.f32.mrb[2].mxu1 }
 0x17e   : > { %2071 = vmatmul.mubr.msk.f32.gmra.mrb[6].mxu0 %vm614_vm3, %v599_v33  ;;  %v2632_v14 = vpop.f32.mrb[3].mxu1 }
 0x17f   : > { %2184 = vmatpush3.bf16.msra.mxu0 %v2153_v12  ;;  %746 = vmatprep.mubr.f32.mxu0 %v3084_v0  ;;  %v2645_v21 = vpop.f32.mrb[4].mxu1 }
 0x180   : > { %2091 = vmatprep.subr.msk.mxu0 %vm663_vm2, %v377_v24  ;;  %v2649_v23 = vpop.f32.mrb[5].mxu1 }
 0x181   : > { %v600_v34 = vpop.trf.xlu1  ;;  %v2656_v26 = vpop.f32.mrb[6].mxu1 }
 0x182   : > { %2072 = vmatmul.mubr.msk.f32.gmra.mrb[8].mxu0 %vm614_vm3, %v600_v34  ;;  %v2660_v28 = vpop.f32.mrb[7].mxu1 }
 0x183   : > { %752 = vmatprep.mubr.f32.mxu0 %v3084_v0 }
 0x185   : > { %v601_v35 = vpop.trf.xlu1 }
 0x186   : > { %2073 = vmatmul.mubr.msk.f32.gmra.mrb[10].mxu0 %vm614_vm3, %v601_v35 }
 0x187   : > { %758 = vmatprep.mubr.f32.mxu0 %v3084_v0 }
 0x189   : > { %v602_v36 = vpop.trf.xlu1 }
 0x18a   : > { %2074 = vmatmul.mubr.msk.f32.gmra.mrb[12].mxu0 %vm614_vm3, %v602_v36 }
 0x18b   : > { %764 = vmatprep.mubr.f32.mxu0 %v3084_v0 }
 0x18d   : > { %v603_v37 = vpop.trf.xlu1 }
 0x18e   : > { %2075 = vmatmul.mubr.msk.f32.gmra.mrb[14].mxu0 %vm614_vm3, %v603_v37 }
 0x18f   : > { %770 = vmatprep.mubr.f32.mxu0 %v3084_v0 }
 0x191   : > { %v604_v38 = vpop.trf.xlu1 }
 0x192   : > { %2076 = vmatmul.mubr.msk.f32.gmra.mrb[16].mxu0 %vm614_vm3, %v604_v38 }
 0x193   : > { %776 = vmatprep.mubr.f32.mxu0 %v3084_v0 }
 0x195   : > { %v605_v39 = vpop.trf.xlu1 }
 0x196   : > { %2077 = vmatmul.mubr.msk.f32.gmra.mrb[18].mxu0 %vm614_vm3, %v605_v39 }
 0x197   : > { %782 = vmatprep.mubr.f32.mxu0 %v3084_v0 }
 0x199   : > { %v606_v40 = vpop.trf.xlu1 }
 0x19a   : > { %2078 = vmatmul.mubr.msk.f32.gmra.mrb[20].mxu0 %vm614_vm3, %v606_v40 }
 0x19b   : > { %788 = vmatprep.mubr.f32.mxu0 %v3084_v0 }
 0x19d   : > { %v607_v41 = vpop.trf.xlu1 }
 0x19e   : > { %2079 = vmatmul.mubr.msk.f32.gmra.mrb[22].mxu0 %vm614_vm3, %v607_v41 }
 0x19f   : > { %794 = vmatprep.mubr.f32.mxu0 %v3084_v0 }
 0x1a1   : > { %v608_v42 = vpop.trf.xlu1 }
 0x1a2   : > { %2080 = vmatmul.mubr.msk.f32.gmra.mrb[24].mxu0 %vm614_vm3, %v608_v42 }
 0x1a3   : > { %800 = vmatprep.mubr.f32.mxu0 %v3084_v0 }
 0x1a5   : > { %v609_v43 = vpop.trf.xlu1 }
 0x1a6   : > { %2081 = vmatmul.mubr.msk.f32.gmra.mrb[26].mxu0 %vm614_vm3, %v609_v43 }
 0x1a7   : > { %806 = vmatprep.mubr.f32.mxu0 %v3084_v0 }
 0x1a9   : > { %v610_v44 = vpop.trf.xlu1 }
 0x1aa   : > { %2082 = vmatmul.mubr.msk.f32.gmra.mrb[28].mxu0 %vm614_vm3, %v610_v44 }
 0x1ab   : > { %812 = vmatprep.mubr.f32.mxu0 %v3084_v0 }
 0x1ad   : > { %v611_v45 = vpop.trf.xlu1 }
 0x1ae   : > { %2083 = vmatmul.mubr.msk.f32.gmra.mrb[30].mxu0 %vm614_vm3, %v611_v45 }
 0x1af   : > { %818 = vmatprep.mubr.f32.mxu0 %v3084_v0 }
 0x1b1   : > { %v612_v46 = vpop.trf.xlu1 }
 0x1b2   : > { %2084 = vmatmul.mubr.msk.f32.gmra.mrb[32].mxu0 %vm614_vm3, %v612_v46 }
 0x1b3   : > { %824 = vmatprep.mubr.f32.mxu0 %v3084_v0 }
 0x1b5   : > { %v613_v47 = vpop.trf.xlu1 }
 0x1b6   : > { %2085 = vmatmul.mubr.msk.f32.gmra.mrb[34].mxu0 %vm614_vm3, %v613_v47 }
 0x1b7   : > { %2146 = vmatprep.mubr.msk.f32.mxu0 %vm2417_vm1, %v3084_v0 }
 0x1ba   : > { %2147 = vmatmul.mubr.msk.f32.vlgmr.msra.gmra.mrb[36].mxu0 %vm304_vm0, %v2501_v18  ;;  %v289_v18 = vld [vmem:[%s3082_s6 + $0x10] sm:$0xff] }
 0x1bb   : > { %2092 = vmatpush1.msk.msra.mxu0 %vm663_vm2, %v2508_v22  ;;  %1475 = vmatprep.mubr.f32.mxu0 %v3084_v0 }
 0x24d   : > { %v2572_v48 = vpop.f32.mrb[4].mxu0 }
 0x24e   : > { %v2574_v49 = vpop.f32.mrb[5].mxu0 }
 0x24f   : > { %v831_v50 = vmax.f32 %v2572_v48, %v2574_v49 }
 0x251   : > { %832 = vmax.xlane.f32.xlu0 %v831_v50  ;;  %v2578_v51 = vpop.f32.mrb[6].mxu0 }
 0x252   : > { %v2580_v52 = vpop.f32.mrb[7].mxu0 }
 0x253   : > { %v834_v53 = vmax.f32 %v2578_v51, %v2580_v52 }
 0x255   : > { %835 = vmax.xlane.f32.xlu0 %v834_v53  ;;  %v2584_v54 = vpop.f32.mrb[8].mxu0 }
 0x256   : > { %v2586_v55 = vpop.f32.mrb[9].mxu0 }
 0x257   : > { %v837_v56 = vmax.f32 %v2584_v54, %v2586_v55 }
 0x259   : > { %v2590_v57 = vpop.f32.mrb[10].mxu0 }
 0x25a   : > { %v2592_v58 = vpop.f32.mrb[11].mxu0 }
 0x25b   : > { %v840_v59 = vmax.f32 %v2590_v57, %v2592_v58 }
 0x25d   : > { %v2596_v60 = vpop.f32.mrb[12].mxu0 }
 0x25e   : > { %v2598_v61 = vpop.f32.mrb[13].mxu0 }
 0x25f   : > { %v843_v62 = vmax.f32 %v2596_v60, %v2598_v61 }
 0x261   : > { %v2602_v63 = vpop.f32.mrb[14].mxu0 }
 0x262   : > { %v2604_v1 = vpop.f32.mrb[15].mxu0 }
 0x263   : > { %v846_v2 = vmax.f32 %v2602_v63, %v2604_v1 }
 0x265   : > { %v2608_v3 = vpop.f32.mrb[16].mxu0 }
 0x266   : > { %v2610_v4 = vpop.f32.mrb[17].mxu0 }
 0x267   : > { %v849_v5 = vmax.f32 %v2608_v3, %v2610_v4 }
 0x269   : > { %v2619_v8 = vpop.f32.mrb[18].mxu0 }
 0x26a   : > { %v2623_v10 = vpop.f32.mrb[19].mxu0 }
 0x26b   : > { %381 = vperm.xlu0 %2205, %v287_v6   ;;  %v852_v12 = vmax.f32 %v2619_v8, %v2623_v10 }
 0x26d   : > { %v2634_v15 = vpop.f32.mrb[20].mxu0 }
 0x26e   : > { %v2636_v16 = vpop.f32.mrb[21].mxu0 }
 0x26f   : > { %386 = vperm.xlu0 %2205, %v288_v13   ;;  %v855_v17 = vmax.f32 %v2634_v15, %v2636_v16 }
 0x271   : > { %v2643_v20 = vpop.f32.mrb[22].mxu0 }
 0x272   : > { %v2647_v22 = vpop.f32.mrb[23].mxu0 }
 0x273   : > { %391 = vperm.xlu0 %2205, %v289_v18   ;;  %v858_v24 = vmax.f32 %v2643_v20, %v2647_v22 }
 0x275   : > { %v2658_v27 = vpop.f32.mrb[24].mxu0 }
 0x276   : > { %v2662_v29 = vpop.f32.mrb[25].mxu0 }
 0x277   : > { %396 = vperm.xlu0 %2205, %v290_v25   ;;  %v861_v30 = vmax.f32 %v2658_v27, %v2662_v29 }
 0x279   : > { %v2666_v31 = vpop.f32.mrb[26].mxu0 }
 0x27a   : > { %v2668_v32 = vpop.f32.mrb[27].mxu0 }
 0x27b   : > { %v864_v33 = vmax.f32 %v2666_v31, %v2668_v32 }
 0x27d   : > { %v2672_v34 = vpop.f32.mrb[28].mxu0 }
 0x27e   : > { %v2674_v35 = vpop.f32.mrb[29].mxu0 }
 0x27f   : > { %v867_v36 = vmax.f32 %v2672_v34, %v2674_v35 }
 0x281   : > { %v2678_v37 = vpop.f32.mrb[30].mxu0 }
 0x282   : > { %v2680_v38 = vpop.f32.mrb[31].mxu0 }
 0x283   : > { %v870_v39 = vmax.f32 %v2678_v37, %v2680_v38 }
 0x285   : > { %v2684_v40 = vpop.f32.mrb[32].mxu0 }
 0x286   : > { %v2686_v41 = vpop.f32.mrb[33].mxu0 }
 0x287   : > { %v873_v42 = vmax.f32 %v2684_v40, %v2686_v41 }
 0x289   : > { %v2690_v43 = vpop.f32.mrb[34].mxu0 }
 0x28a   : > { %v2692_v44 = vpop.f32.mrb[35].mxu0 }
 0x28b   : > { %v876_v45 = vmax.f32 %v2690_v43, %v2692_v44 }
 0x28d   : > { %v1327_v46 = vpop.f32.mrb[36].mxu0 }
 0x28e   : > { %v1328_v47 = vadd.f32 %v1327_v46, %v2506_v19  ;;  %v2148_v50 = vpop.f32.mrb[37].mxu0 }
 0x290   : > { %1331 = vxpose.xlu1.b32.start.end [1/1] (short) %v1328_v47, 128 }
 0x296   : > { %841 = vmax.xlane.f32.xlu0 %v840_v59 }
 0x29a   : > { %844 = vmax.xlane.f32.xlu0 %v843_v62 }
 0x29e   : > { %847 = vmax.xlane.f32.xlu0 %v846_v2 }
 0x2a2   : > { %850 = vmax.xlane.f32.xlu0 %v849_v5 }
 0x2a6   : > { %856 = vmax.xlane.f32.xlu0 %v855_v17 }
 0x2aa   : > { %862 = vmax.xlane.f32.xlu0 %v861_v30 }
 0x2ae   : > { %868 = vmax.xlane.f32.xlu0 %v867_v36 }
 0x2b2   : > { %874 = vmax.xlane.f32.xlu0 %v873_v42 }
 0x2de   : > { %v833_v53 = vpop.xlane.xlu0 %832 }
 0x2df   : > { %v879_v6 = vsub.f32 %v2572_v48, %v833_v53  ;;  %v880_v13 = vsub.f32 %v2574_v49, %v833_v53 }
 0x2e1   : > { %v911_v18 = vmul.f32 1.442695, %v879_v6  ;;  %v913_v25 = vmul.f32 1.442695, %v880_v13 }
 0x2e2   : > { %v836_v0 = vpop.xlane.xlu0 %835 }
 0x2e3   : > { %2206 = vpow2.f32 %v911_v18  ;;  %v881_v19 = vsub.f32 %v2578_v51, %v836_v0  ;;  %v882_v59 = vsub.f32 %v2580_v52, %v836_v0 }
 0x2e4   : > { %2208 = vpow2.f32 %v913_v25 }
 0x2e5   : > { %v915_v62 = vmul.f32 1.442695, %v881_v19  ;;  %v917_v2 = vmul.f32 1.442695, %v882_v59 }
 0x2e7   : > { %2210 = vpow2.f32 %v915_v62 }
 0x2e8   : > { %2212 = vpow2.f32 %v917_v2 }
 0x2ea   : > { %v382_v5 = vpop.permute.xlu0 %381 }
 0x2eb   : > { %v478_v48 = vadd.f32 %v2617_v7, %v382_v5  ;;  %v480_v49 = vadd.f32 %v2621_v9, %v382_v5 }
 0x2ed   : > { %v2207_v17 = vpop.eup %2206 }
 0x2ee   : > { %v2209_v30 = vpop.eup %2208  ;;  %v387_v36 = vpop.permute.xlu0 %386 }
 0x2ef   : > { %1087 = vmatprep.mubr.f32.mxu1 %v2209_v30  ;;  %v484_v42 = vadd.f32 %v2625_v11, %v387_v36  ;;  %v486_v51 = vadd.f32 %v2632_v14, %v387_v36  ;;  %v2705_v46 = vadd.f32 %v2209_v30, %v2207_v17 }
 0x2f1   : > { %v2211_v0 = vpop.eup %2210  ;;  %v2171_v52 = vpack.c.bf16 %v486_v51, %v480_v49  ;;  %v2173_v47 = vpack.c.bf16 %v484_v42, %v478_v48 }
 0x2f2   : > { %v2213_v50 = vpop.eup %2212  ;;  %v392_v53 = vpop.permute.xlu0 %391 }
 0x2f3   : > { %2172 = vmatprep.subr.bf16.mxu1 %v2171_v52  ;;  %838 = vmax.xlane.f32.xlu1 %v837_v56  ;;  %v2710_v7 = vadd.f32 %v2213_v50, %v2211_v0  ;;  %v490_v11 = vadd.f32 %v2645_v21, %v392_v53  ;;  %v492_v14 = vadd.f32 %v2649_v23, %v392_v53 }
 0x2f4   : > { %2174 = vmatpush1.bf16.xpose.msra.mxu1 %v2173_v47 }
 0x2f6   : > { %v397_v9 = vpop.permute.xlu0 %396 }
 0x2f7   : > { %v496_v6 = vadd.f32 %v2656_v26, %v397_v9  ;;  %v498_v13 = vadd.f32 %v2660_v28, %v397_v9  ;;  %853 = vmax.xlane.f32.xlu1 %v852_v12  ;;  %v3086_v12 = vmov 0.0  }
 0x2f9   : > { %v2175_v18 = vpack.c.bf16 %v498_v13, %v492_v14  ;;  %v2177_v25 = vpack.c.bf16 %v496_v6, %v490_v11 }
 0x2fb   : > { %2176 = vmatprep.subr.bf16.mxu1 %v2175_v18  ;;  %859 = vmax.xlane.f32.xlu1 %v858_v24 }
 0x2fc   : > { %2178 = vmatpush1.bf16.xpose.msra.mxu1 %v2177_v25 }
 0x2fd   : > { %2186 = vmatprep.subr.bf16.mxu1 %v2171_v52 }
 0x2ff   : > { %865 = vmax.xlane.f32.xlu1 %v864_v33 }
 0x303   : > { %1088 = vmatmul.mubr.f32.vlgmr.msra.gmra.mrb[8].mxu1 %v2207_v17  ;;  %871 = vmax.xlane.f32.xlu1 %v870_v39 }
 0x304   : > { %1092 = vmatprep.mubr.f32.mxu1 %v2213_v50  ;;  %2188 = vmatpush1.bf16.xpose.msra.mxu1 %v2173_v47 }
 0x305   : > { %2190 = vmatprep.subr.bf16.mxu1 %v2175_v18 }
 0x307   : > { %1093 = vmatmul.mubr.f32.gmra.mrb[10].mxu1 %v2211_v0  ;;  %877 = vmax.xlane.f32.xlu1 %v876_v45 }
 0x30c   : > { %2192 = vmatpush1.bf16.xpose.msra.mxu1 %v2177_v25 }
 0x310   : > { %v1347_v56 = vpop.trf.xlu1 }
 0x311   : > { %2093 = vmatmul.mubr.msk.f32.vlgmr.msra.gmra.mrb[38].mxu0 %vm614_vm3, %v1347_v56 }
 0x312   : > { %1481 = vmatprep.mubr.f32.mxu0 %v3086_v12 }
 0x314   : > { %v1348_v21 = vpop.trf.xlu1 }
 0x315   : > { %2094 = vmatmul.mubr.msk.f32.gmra.mrb[40].mxu0 %vm614_vm3, %v1348_v21 }
 0x316   : > { %1487 = vmatprep.mubr.f32.mxu0 %v3086_v12 }
 0x318   : > { %v1349_v23 = vpop.trf.xlu1 }
 0x319   : > { %2095 = vmatmul.mubr.msk.f32.gmra.mrb[42].mxu0 %vm614_vm3, %v1349_v23 }
 0x31a   : > { %1493 = vmatprep.mubr.f32.mxu0 %v3086_v12 }
 0x31c   : > { %v1350_v24 = vpop.trf.xlu1 }
 0x31d   : > { %2096 = vmatmul.mubr.msk.f32.gmra.mrb[44].mxu0 %vm614_vm3, %v1350_v24 }
 0x31e   : > { %1499 = vmatprep.mubr.f32.mxu0 %v3086_v12 }
 0x320   : > { %v1351_v26 = vpop.trf.xlu1 }
 0x321   : > { %2097 = vmatmul.mubr.msk.f32.gmra.mrb[46].mxu0 %vm614_vm3, %v1351_v26 }
 0x322   : > { %1505 = vmatprep.mubr.f32.mxu0 %v3086_v12 }
 0x323   : > { %v842_v48 = vpop.xlane.xlu0 %841 }
 0x324   : > { %v1352_v28 = vpop.trf.xlu1  ;;  %v885_v49 = vsub.f32 %v2590_v57, %v842_v48  ;;  %v886_v42 = vsub.f32 %v2592_v58, %v842_v48 }
 0x325   : > { %2098 = vmatmul.mubr.msk.f32.gmra.mrb[48].mxu0 %vm614_vm3, %v1352_v28 }
 0x326   : > { %1511 = vmatprep.mubr.f32.mxu0 %v3086_v12  ;;  %v923_v47 = vmul.f32 1.442695, %v885_v49  ;;  %v925_v14 = vmul.f32 1.442695, %v886_v42 }
 0x327   : > { %v845_v36 = vpop.xlane.xlu0 %844 }
 0x328   : > { %v1353_v33 = vpop.trf.xlu1  ;;  %v887_v50 = vsub.f32 %v2596_v60, %v845_v36  ;;  %v888_v6 = vsub.f32 %v2598_v61, %v845_v36 }
 0x329   : > { %2099 = vmatmul.mubr.msk.f32.gmra.mrb[50].mxu0 %vm614_vm3, %v1353_v33 }
 0x32a   : > { %1517 = vmatprep.mubr.f32.mxu0 %v3086_v12  ;;  %v929_v25 = vmul.f32 1.442695, %v888_v6 }
 0x32b   : > { %v848_v53 = vpop.xlane.xlu0 %847 }
 0x32c   : > { %v1354_v39 = vpop.trf.xlu1  ;;  %v890_v60 = vsub.f32 %v2604_v1, %v848_v53 }
 0x32d   : > { %2100 = vmatmul.mubr.msk.f32.gmra.mrb[52].mxu0 %vm614_vm3, %v1354_v39 }
 0x32e   : > { %1523 = vmatprep.mubr.f32.mxu0 %v3086_v12  ;;  %v933_v24 = vmul.f32 1.442695, %v890_v60 }
 0x330   : > { %v1355_v45 = vpop.trf.xlu1 }
 0x331   : > { %2101 = vmatmul.mubr.msk.f32.gmra.mrb[54].mxu0 %vm614_vm3, %v1355_v45 }
 0x332   : > { %1529 = vmatprep.mubr.f32.mxu0 %v3086_v12 }
 0x334   : > { %v1356_v19 = vpop.trf.xlu1 }
 0x335   : > { %2102 = vmatmul.mubr.msk.f32.gmra.mrb[56].mxu0 %vm614_vm3, %v1356_v19 }
 0x336   : > { %1535 = vmatprep.mubr.f32.mxu0 %v3086_v12 }
 0x338   : > { %v1357_v59 = vpop.trf.xlu1 }
 0x339   : > { %2103 = vmatmul.mubr.msk.f32.gmra.mrb[58].mxu0 %vm614_vm3, %v1357_v59 }
 0x33a   : > { %1541 = vmatprep.mubr.f32.mxu0 %v3086_v12 }
 0x33c   : > { %v1358_v62 = vpop.trf.xlu1 }
 0x33d   : > { %2104 = vmatmul.mubr.msk.f32.gmra.mrb[60].mxu0 %vm614_vm3, %v1358_v62 }
 0x33e   : > { %1547 = vmatprep.mubr.f32.mxu0 %v3086_v12 }
 0x340   : > { %v1359_v2 = vpop.trf.xlu1 }
 0x341   : > { %2105 = vmatmul.mubr.msk.f32.gmra.mrb[62].mxu0 %vm614_vm3, %v1359_v2 }
 0x342   : > { %1553 = vmatprep.mubr.f32.mxu0 %v3086_v12 }
 0x344   : > { %v1360_v5 = vpop.trf.xlu1 }
 0x345   : > { %2106 = vmatmul.mubr.msk.f32.gmra.mrb[64].mxu0 %vm614_vm3, %v1360_v5 }
 0x346   : > { %1559 = vmatprep.mubr.f32.mxu0 %v3086_v12 }
 0x348   : > { %v1361_v17 = vpop.trf.xlu1 }
 0x349   : > { %2107 = vmatmul.mubr.msk.f32.gmra.mrb[66].mxu0 %vm614_vm3, %v1361_v17 }
 0x34a   : > { %1565 = vmatprep.mubr.f32.mxu0 %v3086_v12  ;;  %v851_v12 = vpop.xlane.xlu0 %850 }
 0x34b   : > { %v892_v26 = vsub.f32 %v2610_v4, %v851_v12 }
 0x34c   : > { %v1362_v30 = vpop.trf.xlu1 }
 0x34d   : > { %2108 = vmatmul.mubr.msk.f32.gmra.mrb[68].mxu0 %vm614_vm3, %v1362_v30  ;;  %v937_v59 = vmul.f32 1.442695, %v892_v26 }
 0x34e   : > { %v857_v4 = vpop.xlane.xlu0 %856 }
 0x34f   : > { %v896_v42 = vsub.f32 %v2636_v16, %v857_v4 }
 0x380   : > { %v839_v51 = vpop.xlane.xlu1 %838 }
 0x381   : > { %v883_v0 = vsub.f32 %v2584_v54, %v839_v51  ;;  %v884_v52 = vsub.f32 %v2586_v55, %v839_v51  ;;  %v927_v54 = vmul.f32 1.442695, %v887_v50 }
 0x383   : > { %v919_v9 = vmul.f32 1.442695, %v883_v0  ;;  %v921_v11 = vmul.f32 1.442695, %v884_v52 }
 0x384   : > { %v854_v13 = vpop.xlane.xlu1 %853 }
 0x385   : > { %2214 = vpow2.f32 %v919_v9  ;;  %v893_v57 = vsub.f32 %v2619_v8, %v854_v13  ;;  %v894_v58 = vsub.f32 %v2623_v10, %v854_v13  ;;  %v889_v8 = vsub.f32 %v2602_v63, %v848_v53 }
 0x386   : > { %2216 = vpow2.f32 %v921_v11  ;;  %v895_v53 = vsub.f32 %v2634_v15, %v857_v4 }
 0x387   : > { %2218 = vpow2.f32 %v923_v47  ;;  %v939_v18 = vmul.f32 1.442695, %v893_v57  ;;  %v941_v55 = vmul.f32 1.442695, %v894_v58  ;;  %v931_v39 = vmul.f32 1.442695, %v889_v8 }
 0x388   : > { %2220 = vpow2.f32 %v925_v14  ;;  %v860_v56 = vpop.xlane.xlu1 %859  ;;  %v945_v14 = vmul.f32 1.442695, %v896_v42  ;;  %v943_v57 = vmul.f32 1.442695, %v895_v53 }
 0x389   : > { %2222 = vpow2.f32 %v939_v18  ;;  %v897_v61 = vsub.f32 %v2643_v20, %v860_v56  ;;  %v898_v21 = vsub.f32 %v2647_v22, %v860_v56  ;;  %v891_v22 = vsub.f32 %v2608_v3, %v851_v12 }
 0x38a   : > { %2224 = vpow2.f32 %v941_v55 }
 0x38b   : > { %2226 = vpow2.f32 %v927_v54  ;;  %v947_v10 = vmul.f32 1.442695, %v897_v61  ;;  %v949_v23 = vmul.f32 1.442695, %v898_v21  ;;  %v935_v30 = vmul.f32 1.442695, %v891_v22 }
 0x38c   : > { %2228 = vpow2.f32 %v929_v25  ;;  %v866_v28 = vpop.xlane.xlu1 %865 }
 0x38d   : > { %2230 = vpow2.f32 %v947_v10  ;;  %v901_v1 = vsub.f32 %v2666_v31, %v866_v28  ;;  %v902_v33 = vsub.f32 %v2668_v32, %v866_v28 }
 0x38e   : > { %2232 = vpow2.f32 %v949_v23 }
 0x38f   : > { %v2215_v20 = vpop.eup %2214  ;;  %v955_v45 = vmul.f32 1.442695, %v901_v1  ;;  %v957_v19 = vmul.f32 1.442695, %v902_v33  ;;  %2234 = vpow2.f32 %v933_v24 }
 0x390   : > { %v2217_v63 = vpop.eup %2216  ;;  %v872_v62 = vpop.xlane.xlu1 %871 }
 0x391   : > { %v2778_v2 = vpop.eup %2218  ;;  %2236 = vpow2.f32 %v955_v45  ;;  %1097 = vmatprep.mubr.f32.mxu1 %v2217_v63  ;;  %v905_v31 = vsub.f32 %v2678_v37, %v872_v62  ;;  %v906_v32 = vsub.f32 %v2680_v38, %v872_v62  ;;  %v2782_v5 = vadd.f32 %v2217_v63, %v2215_v20 }
 0x392   : > { %v2784_v17 = vpop.eup %2220  ;;  %2238 = vpow2.f32 %v957_v19  ;;  %1098 = vmatmul.mubr.f32.gmra.mrb[12].mxu1 %v2215_v20 }
 0x393   : > { %v2223_v3 = vpop.eup %2222  ;;  %2240 = vpow2.f32 %v931_v39  ;;  %v963_v48 = vmul.f32 1.442695, %v905_v31  ;;  %v965_v36 = vmul.f32 1.442695, %v906_v32  ;;  %1102 = vmatprep.mubr.f32.mxu1 %v2784_v17 }
 0x394   : > { %v2225_v49 = vpop.eup %2224  ;;  %2242 = vpow2.f32 %v937_v59  ;;  %v878_v37 = vpop.xlane.xlu1 %877 }
 0x395   : > { %v2788_v51 = vpop.eup %2226  ;;  %2244 = vpow2.f32 %v963_v48  ;;  %v909_v38 = vsub.f32 %v2690_v43, %v878_v37  ;;  %v910_v0 = vsub.f32 %v2692_v44, %v878_v37  ;;  %v2792_v52 = vadd.f32 %v2225_v49, %v2223_v3  ;;  %v863_v43 = vpop.xlane.xlu0 %862 }
 0x396   : > { %v2794_v47 = vpop.eup %2228  ;;  %2246 = vpow2.f32 %v965_v36  ;;  %1103 = vmatmul.mubr.f32.gmra.mrb[14].mxu1 %v2778_v2  ;;  %v900_v58 = vsub.f32 %v2662_v29, %v863_v43  ;;  %v899_v60 = vsub.f32 %v2658_v27, %v863_v43 }
 0x397   : > { %v2231_v50 = vpop.eup %2230  ;;  %2248 = vpow2.f32 %v935_v30  ;;  %v971_v16 = vmul.f32 1.442695, %v909_v38  ;;  %v973_v9 = vmul.f32 1.442695, %v910_v0  ;;  %1107 = vmatprep.mubr.f32.mxu1 %v2794_v47 }
 0x398   : > { %v2233_v11 = vpop.eup %2232  ;;  %v953_v12 = vmul.f32 1.442695, %v900_v58  ;;  %v951_v10 = vmul.f32 1.442695, %v899_v60 }
 0x399   : > { %2250 = vpow2.f32 %v971_v16  ;;  %v2799_v44 = vadd.f32 %v2233_v11, %v2231_v50  ;;  %v2801_v6 = vpop.eup %2234  ;;  %v869_v21 = vpop.xlane.xlu0 %868 }
 0x39a   : > { %2252 = vpow2.f32 %v973_v9  ;;  %1108 = vmatmul.mubr.f32.gmra.mrb[16].mxu1 %v2788_v51  ;;  %v904_v24 = vsub.f32 %v2674_v35, %v869_v21  ;;  %v903_v28 = vsub.f32 %v2672_v34, %v869_v21 }
 0x39b   : > { %v2237_v13 = vpop.eup %2236  ;;  %1112 = vmatprep.mubr.f32.mxu1 %v2801_v6  ;;  %2254 = vpow2.f32 %v945_v14 }
 0x39c   : > { %v2239_v15 = vpop.eup %2238  ;;  %2256 = vpow2.f32 %v943_v57  ;;  %v961_v1 = vmul.f32 1.442695, %v904_v24  ;;  %v959_v39 = vmul.f32 1.442695, %v903_v28 }
 0x39d   : > { %v2806_v54 = vpop.eup %2240  ;;  %v2808_v18 = vadd.f32 %v2239_v15, %v2237_v13  ;;  %2258 = vpow2.f32 %v953_v12  ;;  %v875_v20 = vpop.xlane.xlu0 %874 }
 0x39e   : > { %v2810_v55 = vpop.eup %2242  ;;  %1113 = vmatmul.mubr.f32.gmra.mrb[18].mxu1 %v2806_v54  ;;  %2260 = vpow2.f32 %v951_v10  ;;  %v908_v35 = vsub.f32 %v2686_v41, %v875_v20  ;;  %v907_v45 = vsub.f32 %v2684_v40, %v875_v20 }
 0x39f   : > { %v2245_v25 = vpop.eup %2244  ;;  %1117 = vmatprep.mubr.f32.mxu1 %v2810_v55  ;;  %2262 = vpow2.f32 %v961_v1 }
 0x3a0   : > { %v2247_v56 = vpop.eup %2246  ;;  %2264 = vpow2.f32 %v959_v39  ;;  %v969_v34 = vmul.f32 1.442695, %v908_v35  ;;  %v967_v63 = vmul.f32 1.442695, %v907_v45 }
 0x3a1   : > { %v2815_v61 = vpop.eup %2248  ;;  %v2817_v29 = vadd.f32 %v2247_v56, %v2245_v25 }
 0x3a2   : > { %1118 = vmatmul.mubr.f32.gmra.mrb[20].mxu1 %v2815_v61  ;;  %2266 = vpow2.f32 %v969_v34 }
 0x3a3   : > { %v2251_v8 = vpop.eup %2250  ;;  %1122 = vmatprep.mubr.f32.mxu1 %v2225_v49  ;;  %2268 = vpow2.f32 %v967_v63 }
 0x3a4   : > { %v2253_v23 = vpop.eup %2252 }
 0x3a5   : > { %v2821_v26 = vadd.f32 %v2253_v23, %v2251_v8  ;;  %v2823_v27 = vpop.eup %2254 }
 0x3a6   : > { %1123 = vmatmul.mubr.f32.gmra.mrb[22].mxu1 %v2223_v3  ;;  %v2827_v33 = vpop.eup %2256 }
 0x3a7   : > { %1127 = vmatprep.mubr.f32.mxu1 %v2823_v27  ;;  %v2831_v22 = vpop.eup %2258 }
 0x3a8   : > { %v2835_v19 = vpop.eup %2260 }
 0x3a9   : > { %v2838_v59 = vpop.eup %2262 }
 0x3aa   : > { %1128 = vmatmul.mubr.f32.gmra.mrb[24].mxu1 %v2827_v33  ;;  %v2841_v41 = vpop.eup %2264 }
 0x3ab   : > { %1132 = vmatprep.mubr.f32.mxu1 %v2233_v11 }
 0x3ac   : > { %v2844_v40 = vpop.eup %2266 }
 0x3ad   : > { %v2847_v62 = vpop.eup %2268 }
 0x3ae   : > { %1133 = vmatmul.mubr.f32.gmra.mrb[26].mxu1 %v2231_v50 }
 0x3af   : > { %1137 = vmatprep.mubr.f32.mxu1 %v2831_v22 }
 0x3b2   : > { %1138 = vmatmul.mubr.f32.gmra.mrb[28].mxu1 %v2835_v19 }
 0x3b3   : > { %1142 = vmatprep.mubr.f32.mxu1 %v2239_v15 }
 0x3b6   : > { %1143 = vmatmul.mubr.f32.gmra.mrb[30].mxu1 %v2237_v13 }
 0x3b7   : > { %1147 = vmatprep.mubr.f32.mxu1 %v2838_v59 }
 0x3ba   : > { %1148 = vmatmul.mubr.f32.gmra.mrb[32].mxu1 %v2841_v41 }
 0x3bb   : > { %1152 = vmatprep.mubr.f32.mxu1 %v2247_v56 }
 0x3be   : > { %1153 = vmatmul.mubr.f32.gmra.mrb[34].mxu1 %v2245_v25 }
 0x3bf   : > { %1157 = vmatprep.mubr.f32.mxu1 %v2844_v40 }
 0x3c2   : > { %1158 = vmatmul.mubr.f32.gmra.mrb[36].mxu1 %v2847_v62 }
 0x3c3   : > { %1162 = vmatprep.mubr.f32.mxu1 %v2253_v23 }
 0x3c6   : > { %1163 = vmatmul.mubr.f32.gmra.mrb[38].mxu1 %v2251_v8 }
 0x3d6   : > { %v2850_v4 = vpop.f32.mrb[8].mxu1 }
 0x3d7   : > { %v1091_v31 = vpop.f32.mrb[9].mxu1 }
 0x3da   : > { %v2852_v32 = vpop.f32.mrb[10].mxu1 }
 0x3db   : > { %v1096_v3 = vpop.f32.mrb[11].mxu1 }
 0x3e4   : > { %v2854_v30 = vpop.f32.mrb[38].mxu0 }
 0x3e5   : > { %v2856_v48 = vpop.f32.mrb[39].mxu0 }
 0x3e6   : > { %v1572_v36 = vmax.f32 %v2854_v30, %v2856_v48 }
 0x3e8   : > { %1573 = vmax.xlane.f32.xlu0 %v1572_v36  ;;  %v2860_v49 = vpop.f32.mrb[40].mxu0 }
 0x3e9   : > { %v2862_v42 = vpop.f32.mrb[41].mxu0 }
 0x3ea   : > { %v1575_v37 = vmax.f32 %v2860_v49, %v2862_v42 }
 0x3ec   : > { %v2866_v38 = vpop.f32.mrb[42].mxu0  ;;  %1576 = vmax.xlane.f32.xlu1 %v1575_v37 }
 0x3ed   : > { %v2868_v0 = vpop.f32.mrb[43].mxu0 }
 0x3ee   : > { %v1578_v50 = vmax.f32 %v2866_v38, %v2868_v0 }
 0x3f0   : > { %1579 = vmax.xlane.f32.xlu0 %v1578_v50  ;;  %v2872_v53 = vpop.f32.mrb[44].mxu0 }
 0x3f1   : > { %v2874_v16 = vpop.f32.mrb[45].mxu0 }
 0x3f2   : > { %v1581_v9 = vmax.f32 %v2872_v53, %v2874_v16 }
 0x3f4   : > { %v2878_v11 = vpop.f32.mrb[46].mxu0  ;;  %1582 = vmax.xlane.f32.xlu1 %v1581_v9 }
 0x3f5   : > { %v2880_v14 = vpop.f32.mrb[47].mxu0 }
 0x3f6   : > { %v1584_v43 = vmax.f32 %v2878_v11, %v2880_v14 }
 0x3f8   : > { %1585 = vmax.xlane.f32.xlu0 %v1584_v43  ;;  %v2884_v13 = vpop.f32.mrb[48].mxu0 }
 0x3f9   : > { %v2886_v57 = vpop.f32.mrb[49].mxu0 }
 0x3fa   : > { %v1587_v15 = vmax.f32 %v2884_v13, %v2886_v57 }
 0x3fc   : > { %v2890_v58 = vpop.f32.mrb[50].mxu0  ;;  %1588 = vmax.xlane.f32.xlu1 %v1587_v15 }
 0x3fd   : > { %v2892_v25 = vpop.f32.mrb[51].mxu0 }
 0x3fe   : > { %v1590_v60 = vmax.f32 %v2890_v58, %v2892_v25 }
 0x400   : > { %1591 = vmax.xlane.f32.xlu0 %v1590_v60  ;;  %v2896_v56 = vpop.f32.mrb[52].mxu0 }
 0x401   : > { %v2898_v12 = vpop.f32.mrb[53].mxu0 }
 0x402   : > { %v1593_v21 = vmax.f32 %v2896_v56, %v2898_v12 }
 0x404   : > { %v2902_v8 = vpop.f32.mrb[54].mxu0  ;;  %1594 = vmax.xlane.f32.xlu1 %v1593_v21 }
 0x405   : > { %v2904_v10 = vpop.f32.mrb[55].mxu0 }
 0x406   : > { %v1596_v23 = vmax.f32 %v2902_v8, %v2904_v10 }
 0x408   : > { %1597 = vmax.xlane.f32.xlu0 %v1596_v23  ;;  %v2908_v24 = vpop.f32.mrb[56].mxu0 }
 0x409   : > { %v2910_v28 = vpop.f32.mrb[57].mxu0 }
 0x40a   : > { %v1599_v1 = vmax.f32 %v2908_v24, %v2910_v28 }
 0x40c   : > { %v2914_v20 = vpop.f32.mrb[58].mxu0  ;;  %1600 = vmax.xlane.f32.xlu1 %v1599_v1 }
 0x40d   : > { %v2916_v39 = vpop.f32.mrb[59].mxu0 }
 0x40e   : > { %v1602_v35 = vmax.f32 %v2914_v20, %v2916_v39 }
 0x410   : > { %1603 = vmax.xlane.f32.xlu0 %v1602_v35  ;;  %v2920_v45 = vpop.f32.mrb[60].mxu0  ;;  %v984_v35 = vadd.f32 %v2784_v17, %v2778_v2  ;;  %v1005_v2 = vadd.f32 %v2835_v19, %v2831_v22  ;;  %v1017_v17 = vadd.f32 %v2847_v62, %v2844_v40 }
 0x411   : > { %v2922_v34 = vpop.f32.mrb[61].mxu0 }
 0x412   : > { %v1605_v63 = vmax.f32 %v2920_v45, %v2922_v34 }
 0x414   : > { %v2926_v31 = vpop.f32.mrb[62].mxu0  ;;  %1606 = vmax.xlane.f32.xlu1 %v1605_v63  ;;  %v987_v63 = vadd.f32 %v2794_v47, %v2788_v51 }
 0x415   : > { %v2928_v3 = vpop.f32.mrb[63].mxu0 }
 0x416   : > { %v1608_v36 = vmax.f32 %v2926_v31, %v2928_v3 }
 0x418   : > { %1609 = vmax.xlane.f32.xlu0 %v1608_v36  ;;  %v2932_v37 = vpop.f32.mrb[64].mxu0  ;;  %v990_v36 = vadd.f32 %v2806_v54, %v2801_v6 }
 0x419   : > { %v2934_v50 = vpop.f32.mrb[65].mxu0 }
 0x41a   : > { %v1611_v9 = vmax.f32 %v2932_v37, %v2934_v50 }
 0x41c   : > { %v2938_v43 = vpop.f32.mrb[66].mxu0  ;;  %1612 = vmax.xlane.f32.xlu1 %v1611_v9 }
 0x41d   : > { %v2940_v15 = vpop.f32.mrb[67].mxu0 }
 0x41e   : > { %v1614_v60 = vmax.f32 %v2938_v43, %v2940_v15 }
 0x420   : > { %1615 = vmax.xlane.f32.xlu0 %v1614_v60  ;;  %v2944_v21 = vpop.f32.mrb[68].mxu0 }
 0x421   : > { %v2946_v23 = vpop.f32.mrb[69].mxu0 }
 0x422   : > { %v1617_v1 = vmax.f32 %v2944_v21, %v2946_v23 }
 0x424   : > { %976 = vadd.xlane.f32.xlu0 %v2705_v46  ;;  %1618 = vmax.xlane.f32.xlu1 %v1617_v1  ;;  %v993_v46 = vadd.f32 %v2815_v61, %v2810_v55 }
 0x428   : > { %979 = vadd.xlane.f32.xlu0 %v2710_v7  ;;  %v999_v7 = vadd.f32 %v2827_v33, %v2823_v27 }
 0x42c   : > { %982 = vadd.xlane.f32.xlu0 %v2782_v5  ;;  %v1011_v5 = vadd.f32 %v2841_v41, %v2838_v59 }
 0x430   : > { %985 = vadd.xlane.f32.xlu0 %v984_v35 }
 0x434   : > { %988 = vadd.xlane.f32.xlu0 %v987_v63 }
 0x438   : > { %991 = vadd.xlane.f32.xlu0 %v990_v36 }
 0x43c   : > { %994 = vadd.xlane.f32.xlu0 %v993_v46 }
 0x440   : > { %997 = vadd.xlane.f32.xlu0 %v2792_v52 }
 0x444   : > { %1000 = vadd.xlane.f32.xlu0 %v999_v7 }
 0x448   : > { %1003 = vadd.xlane.f32.xlu0 %v2799_v44 }
 0x44c   : > { %1006 = vadd.xlane.f32.xlu0 %v1005_v2 }
 0x450   : > { %1009 = vadd.xlane.f32.xlu0 %v2808_v18 }
 0x454   : > { %1012 = vadd.xlane.f32.xlu0 %v1011_v5 }
 0x458   : > { %1015 = vadd.xlane.f32.xlu0 %v2817_v29 }
 0x45c   : > { %1018 = vadd.xlane.f32.xlu0 %v1017_v17 }
 0x460   : > { %1021 = vadd.xlane.f32.xlu0 %v2821_v26 }
 0x465   : > { %v2974_v51 = vpop.f32.mrb[12].mxu1 }
 0x466   : > { %v1101_v52 = vpop.f32.mrb[13].mxu1 }
 0x469   : > { %v2976_v47 = vpop.f32.mrb[14].mxu1 }
 0x46a   : > { %v1106_v44 = vpop.f32.mrb[15].mxu1 }
 0x46d   : > { %v2978_v6 = vpop.f32.mrb[16].mxu1 }
 0x46e   : > { %v1111_v54 = vpop.f32.mrb[17].mxu1 }
 0x471   : > { %v2980_v18 = vpop.f32.mrb[18].mxu1 }
 0x472   : > { %v1116_v55 = vpop.f32.mrb[19].mxu1 }
 0x475   : > { %v2982_v61 = vpop.f32.mrb[20].mxu1  ;;  %v1574_v29 = vpop.xlane.xlu0 %1573 }
 0x476   : > { %v1121_v27 = vpop.f32.mrb[21].mxu1  ;;  %v1620_v33 = vsub.f32 %v2854_v30, %v1574_v29  ;;  %v1621_v26 = vsub.f32 %v2856_v48, %v1574_v29 }
 0x478   : > { %v1652_v22 = vmul.f32 1.442695, %v1620_v33  ;;  %v1654_v19 = vmul.f32 1.442695, %v1621_v26 }
 0x479   : > { %v2986_v59 = vpop.f32.mrb[22].mxu1  ;;  %v1577_v41 = vpop.xlane.xlu1 %1576 }
 0x47a   : > { %2270 = vpow2.f32 %v1652_v22  ;;  %v1126_v40 = vpop.f32.mrb[23].mxu1  ;;  %v1622_v62 = vsub.f32 %v2860_v49, %v1577_v41  ;;  %v1623_v9 = vsub.f32 %v2862_v42, %v1577_v41 }
 0x47b   : > { %2272 = vpow2.f32 %v1654_v19 }
 0x47c   : > { %v1656_v60 = vmul.f32 1.442695, %v1622_v62  ;;  %v1658_v1 = vmul.f32 1.442695, %v1623_v9 }
 0x47d   : > { %v2990_v35 = vpop.f32.mrb[24].mxu1  ;;  %v1580_v63 = vpop.xlane.xlu0 %1579 }
 0x47e   : > { %2274 = vpow2.f32 %v1656_v60  ;;  %v1131_v30 = vpop.f32.mrb[25].mxu1  ;;  %v1624_v48 = vsub.f32 %v2866_v38, %v1580_v63  ;;  %v1625_v36 = vsub.f32 %v2868_v0, %v1580_v63 }
 0x47f   : > { %2276 = vpow2.f32 %v1658_v1 }
 0x480   : > { %v1660_v46 = vmul.f32 1.442695, %v1624_v48  ;;  %v1662_v7 = vmul.f32 1.442695, %v1625_v36 }
 0x481   : > { %v2994_v2 = vpop.f32.mrb[26].mxu1  ;;  %v1583_v49 = vpop.xlane.xlu1 %1582 }
 0x482   : > { %2278 = vpow2.f32 %v1660_v46  ;;  %v1136_v42 = vpop.f32.mrb[27].mxu1  ;;  %v1626_v5 = vsub.f32 %v2872_v53, %v1583_v49  ;;  %v1627_v17 = vsub.f32 %v2874_v16, %v1583_v49 }
 0x483   : > { %2280 = vpow2.f32 %v1662_v7 }
 0x484   : > { %v2271_v52 = vpop.eup %2270  ;;  %v1664_v44 = vmul.f32 1.442695, %v1626_v5  ;;  %v1666_v54 = vmul.f32 1.442695, %v1627_v17 }
 0x485   : > { %v2273_v55 = vpop.eup %2272  ;;  %v2998_v38 = vpop.f32.mrb[28].mxu1 }
 0x486   : > { %v1586_v0 = vpop.xlane.xlu0 %1585  ;;  %2282 = vpow2.f32 %v1664_v44  ;;  %v1141_v29 = vpop.f32.mrb[29].mxu1  ;;  %1828 = vmatprep.mubr.f32.mxu1 %v2273_v55  ;;  %v1716_v26 = vadd.f32 %v2273_v55, %v2271_v52 }
 0x487   : > { %v1628_v27 = vsub.f32 %v2878_v11, %v1586_v0  ;;  %v1629_v33 = vsub.f32 %v2880_v14, %v1586_v0  ;;  %2284 = vpow2.f32 %v1666_v54  ;;  %1829 = vmatmul.mubr.f32.vlgmr.msra.gmra.mrb[40].mxu1 %v2271_v52 }
 0x488   : > { %v2275_v53 = vpop.eup %2274  ;;  %1717 = vadd.xlane.f32.xlu1 %v1716_v26 }
 0x489   : > { %v1668_v16 = vmul.f32 1.442695, %v1628_v27  ;;  %v1670_v22 = vmul.f32 1.442695, %v1629_v33  ;;  %v2277_v19 = vpop.eup %2276  ;;  %v3002_v41 = vpop.f32.mrb[30].mxu1 }
 0x48a   : > { %v1589_v40 = vpop.xlane.xlu1 %1588  ;;  %v1146_v62 = vpop.f32.mrb[31].mxu1  ;;  %1833 = vmatprep.mubr.f32.mxu1 %v2277_v19  ;;  %v1719_v14 = vadd.f32 %v2277_v19, %v2275_v53 }
 0x48b   : > { %2286 = vpow2.f32 %v1668_v16  ;;  %v1630_v9 = vsub.f32 %v2884_v13, %v1589_v40  ;;  %v1631_v11 = vsub.f32 %v2886_v57, %v1589_v40  ;;  %1834 = vmatmul.mubr.f32.gmra.mrb[42].mxu1 %v2275_v53 }
 0x48c   : > { %2288 = vpow2.f32 %v1670_v22  ;;  %v2279_v60 = vpop.eup %2278  ;;  %1720 = vadd.xlane.f32.xlu1 %v1719_v14 }
 0x48d   : > { %v1672_v1 = vmul.f32 1.442695, %v1630_v9  ;;  %v1674_v63 = vmul.f32 1.442695, %v1631_v11  ;;  %v2281_v30 = vpop.eup %2280  ;;  %v3006_v48 = vpop.f32.mrb[32].mxu1 }
 0x48e   : > { %v1592_v36 = vpop.xlane.xlu0 %1591  ;;  %v1151_v46 = vpop.f32.mrb[33].mxu1  ;;  %1838 = vmatprep.mubr.f32.mxu1 %v2281_v30  ;;  %v1722_v13 = vadd.f32 %v2281_v30, %v2279_v60 }
 0x48f   : > { %2290 = vpow2.f32 %v1672_v1  ;;  %v1632_v7 = vsub.f32 %v2890_v58, %v1592_v36  ;;  %v1633_v49 = vsub.f32 %v2892_v25, %v1592_v36  ;;  %1839 = vmatmul.mubr.f32.gmra.mrb[44].mxu1 %v2279_v60 }
 0x490   : > { %2292 = vpow2.f32 %v1674_v63  ;;  %v2283_v57 = vpop.eup %2282  ;;  %1723 = vadd.xlane.f32.xlu1 %v1722_v13 }
 0x491   : > { %v1676_v42 = vmul.f32 1.442695, %v1632_v7  ;;  %v1678_v5 = vmul.f32 1.442695, %v1633_v49  ;;  %v2285_v17 = vpop.eup %2284  ;;  %v3010_v52 = vpop.f32.mrb[34].mxu1 }
 0x492   : > { %v1595_v44 = vpop.xlane.xlu1 %1594  ;;  %v1156_v54 = vpop.f32.mrb[35].mxu1  ;;  %1843 = vmatprep.mubr.f32.mxu1 %v2285_v17  ;;  %v1725_v25 = vadd.f32 %v2285_v17, %v2283_v57 }
 0x493   : > { %2294 = vpow2.f32 %v1676_v42  ;;  %v1634_v55 = vsub.f32 %v2896_v56, %v1595_v44  ;;  %v1635_v58 = vsub.f32 %v2898_v12, %v1595_v44  ;;  %1844 = vmatmul.mubr.f32.gmra.mrb[46].mxu1 %v2283_v57 }
 0x494   : > { %2296 = vpow2.f32 %v1678_v5  ;;  %1726 = vadd.xlane.f32.xlu1 %v1725_v25 }
 0x495   : > { %v2287_v0 = vpop.eup %2286  ;;  %v1680_v29 = vmul.f32 1.442695, %v1634_v55  ;;  %v1682_v27 = vmul.f32 1.442695, %v1635_v58  ;;  %v3014_v26 = vpop.f32.mrb[36].mxu1 }
 0x496   : > { %v2289_v33 = vpop.eup %2288  ;;  %v1598_v53 = vpop.xlane.xlu0 %1597 }
 0x497   : > { %2298 = vpow2.f32 %v1680_v29  ;;  %v1161_v16 = vpop.f32.mrb[37].mxu1  ;;  %v1636_v22 = vsub.f32 %v2902_v8, %v1598_v53  ;;  %v1637_v19 = vsub.f32 %v2904_v10, %v1598_v53  ;;  %1848 = vmatprep.mubr.f32.mxu1 %v2289_v33  ;;  %v1728_v56 = vadd.f32 %v2289_v33, %v2287_v0 }
 0x498   : > { %2300 = vpow2.f32 %v1682_v27  ;;  %1849 = vmatmul.mubr.f32.gmra.mrb[48].mxu1 %v2287_v0 }
 0x499   : > { %v2291_v12 = vpop.eup %2290  ;;  %v1684_v40 = vmul.f32 1.442695, %v1636_v22  ;;  %v1686_v62 = vmul.f32 1.442695, %v1637_v19  ;;  %1729 = vadd.xlane.f32.xlu1 %v1728_v56  ;;  %v3018_v11 = vpop.f32.mrb[38].mxu1 }
 0x49a   : > { %v2293_v9 = vpop.eup %2292  ;;  %v1601_v14 = vpop.xlane.xlu1 %1600 }
 0x49b   : > { %2302 = vpow2.f32 %v1684_v40  ;;  %v1166_v60 = vpop.f32.mrb[39].mxu1  ;;  %1853 = vmatprep.mubr.f32.mxu1 %v2293_v9  ;;  %v1638_v1 = vsub.f32 %v2908_v24, %v1601_v14  ;;  %v1639_v8 = vsub.f32 %v2910_v28, %v1601_v14  ;;  %v1731_v10 = vadd.f32 %v2293_v9, %v2291_v12 }
 0x49c   : > { %2304 = vpow2.f32 %v1686_v62  ;;  %1854 = vmatmul.mubr.f32.gmra.mrb[50].mxu1 %v2291_v12 }
 0x49d   : > { %v2295_v63 = vpop.eup %2294  ;;  %v1688_v30 = vmul.f32 1.442695, %v1638_v1  ;;  %v1690_v36 = vmul.f32 1.442695, %v1639_v8  ;;  %1732 = vadd.xlane.f32.xlu1 %v1731_v10  ;;  %v1604_v7 = vpop.xlane.xlu0 %1603 }
 0x49e   : > { %v2297_v46 = vpop.eup %2296  ;;  %v1640_v49 = vsub.f32 %v2914_v20, %v1604_v7  ;;  %v1641_v13 = vsub.f32 %v2916_v39, %v1604_v7 }
 0x49f   : > { %2306 = vpow2.f32 %v1688_v30  ;;  %1858 = vmatprep.mubr.f32.mxu1 %v2297_v46  ;;  %v1734_v57 = vadd.f32 %v2297_v46, %v2295_v63 }
 0x4a0   : > { %2308 = vpow2.f32 %v1690_v36  ;;  %1859 = vmatmul.mubr.f32.gmra.mrb[52].mxu1 %v2295_v63  ;;  %v1692_v28 = vmul.f32 1.442695, %v1640_v49  ;;  %v1694_v42 = vmul.f32 1.442695, %v1641_v13 }
 0x4a1   : > { %v2299_v24 = vpop.eup %2298  ;;  %1735 = vadd.xlane.f32.xlu1 %v1734_v57  ;;  %v1607_v17 = vpop.xlane.xlu1 %1606 }
 0x4a2   : > { %v2301_v5 = vpop.eup %2300  ;;  %2310 = vpow2.f32 %v1692_v28  ;;  %v1642_v44 = vsub.f32 %v2920_v45, %v1607_v17  ;;  %v1643_v54 = vsub.f32 %v2922_v34, %v1607_v17 }
 0x4a3   : > { %1863 = vmatprep.mubr.f32.mxu1 %v2301_v5  ;;  %v1737_v55 = vadd.f32 %v2301_v5, %v2299_v24  ;;  %2312 = vpow2.f32 %v1694_v42 }
 0x4a4   : > { %1864 = vmatmul.mubr.f32.gmra.mrb[54].mxu1 %v2299_v24  ;;  %v1696_v39 = vmul.f32 1.442695, %v1642_v44  ;;  %v1698_v58 = vmul.f32 1.442695, %v1643_v54 }
 0x4a5   : > { %v2303_v20 = vpop.eup %2302  ;;  %1738 = vadd.xlane.f32.xlu1 %v1737_v55  ;;  %v1610_v0 = vpop.xlane.xlu0 %1609 }
 0x4a6   : > { %v2305_v25 = vpop.eup %2304  ;;  %2314 = vpow2.f32 %v1696_v39  ;;  %v1644_v29 = vsub.f32 %v2926_v31, %v1610_v0  ;;  %v1645_v27 = vsub.f32 %v2928_v3, %v1610_v0 }
 0x4a7   : > { %1868 = vmatprep.mubr.f32.mxu1 %v2305_v25  ;;  %v1740_v33 = vadd.f32 %v2305_v25, %v2303_v20  ;;  %2316 = vpow2.f32 %v1698_v58 }
 0x4a8   : > { %1869 = vmatmul.mubr.f32.gmra.mrb[56].mxu1 %v2303_v20  ;;  %v1700_v34 = vmul.f32 1.442695, %v1644_v29  ;;  %v1702_v53 = vmul.f32 1.442695, %v1645_v27 }
 0x4a9   : > { %v2307_v45 = vpop.eup %2306  ;;  %1741 = vadd.xlane.f32.xlu1 %v1740_v33  ;;  %v1613_v22 = vpop.xlane.xlu1 %1612 }
 0x4aa   : > { %v2309_v16 = vpop.eup %2308  ;;  %2318 = vpow2.f32 %v1700_v34  ;;  %v1646_v19 = vsub.f32 %v2932_v37, %v1613_v22  ;;  %v1647_v56 = vsub.f32 %v2934_v50, %v1613_v22 }
 0x4ab   : > { %1873 = vmatprep.mubr.f32.mxu1 %v2309_v16  ;;  %v1743_v12 = vadd.f32 %v2309_v16, %v2307_v45  ;;  %2320 = vpow2.f32 %v1702_v53 }
 0x4ac   : > { %1874 = vmatmul.mubr.f32.gmra.mrb[58].mxu1 %v2307_v45  ;;  %v2311_v31 = vpop.eup %2310  ;;  %v1704_v3 = vmul.f32 1.442695, %v1646_v19  ;;  %v1706_v40 = vmul.f32 1.442695, %v1647_v56 }
 0x4ad   : > { %1744 = vadd.xlane.f32.xlu1 %v1743_v12  ;;  %v2313_v62 = vpop.eup %2312  ;;  %v1616_v9 = vpop.xlane.xlu0 %1615 }
 0x4ae   : > { %2322 = vpow2.f32 %v1704_v3  ;;  %v1648_v14 = vsub.f32 %v2938_v43, %v1616_v9  ;;  %v1649_v60 = vsub.f32 %v2940_v15, %v1616_v9  ;;  %1878 = vmatprep.mubr.f32.mxu1 %v2313_v62  ;;  %v1746_v1 = vadd.f32 %v2313_v62, %v2311_v31 }
 0x4af   : > { %2324 = vpow2.f32 %v1706_v40 }
 0x4b0   : > { %1879 = vmatmul.mubr.f32.gmra.mrb[60].mxu1 %v2311_v31  ;;  %v2315_v37 = vpop.eup %2314  ;;  %v1708_v50 = vmul.f32 1.442695, %v1648_v14  ;;  %v1710_v8 = vmul.f32 1.442695, %v1649_v60 }
 0x4b1   : > { %1747 = vadd.xlane.f32.xlu1 %v1746_v1  ;;  %v2317_v10 = vpop.eup %2316  ;;  %v977_v63 = vpop.xlane.xlu0 %976 }
 0x4b2   : > { %v1619_v30 = vpop.xlane.xlu1 %1618  ;;  %2326 = vpow2.f32 %v1708_v50  ;;  %1883 = vmatprep.mubr.f32.mxu1 %v2317_v10  ;;  %v1749_v43 = vadd.f32 %v2317_v10, %v2315_v37 }
 0x4b3   : > { %v1650_v36 = vsub.f32 %v2944_v21, %v1619_v30  ;;  %v1651_v46 = vsub.f32 %v2946_v23, %v1619_v30  ;;  %2328 = vpow2.f32 %v1710_v8 }
 0x4b4   : > { %1884 = vmatmul.mubr.f32.gmra.mrb[62].mxu1 %v2315_v37  ;;  %v2319_v15 = vpop.eup %2318  ;;  %2330 = vrcp.f32 %v977_v63 }
 0x4b5   : > { %v1712_v7 = vmul.f32 1.442695, %v1650_v36  ;;  %v1714_v49 = vmul.f32 1.442695, %v1651_v46  ;;  %1750 = vadd.xlane.f32.xlu1 %v1749_v43  ;;  %v2321_v13 = vpop.eup %2320  ;;  %v980_v57 = vpop.xlane.xlu0 %979 }
 0x4b6   : > { %1888 = vmatprep.mubr.f32.mxu1 %v2321_v13  ;;  %v1752_v24 = vadd.f32 %v2321_v13, %v2319_v15 }
 0x4b7   : > { %2332 = vpow2.f32 %v1712_v7 }
 0x4b8   : > { %2334 = vpow2.f32 %v1714_v49  ;;  %1889 = vmatmul.mubr.f32.gmra.mrb[64].mxu1 %v2319_v15  ;;  %v2323_v28 = vpop.eup %2322 }
 0x4b9   : > { %2336 = vrcp.f32 %v980_v57  ;;  %1753 = vadd.xlane.f32.xlu1 %v1752_v24  ;;  %v2325_v21 = vpop.eup %2324  ;;  %v983_v23 = vpop.xlane.xlu0 %982  ;;  %v2398_v57 = vld [vmem:[%s2482_s10] sm:$0xff] }
 0x4ba   : > { %2338 = vrcp.f32 %v983_v23  ;;  %1893 = vmatprep.mubr.f32.mxu1 %v2325_v21  ;;  %v1755_v42 = vadd.f32 %v2325_v21, %v2323_v28 }
 0x4bc   : > { %1894 = vmatmul.mubr.f32.gmra.mrb[66].mxu1 %v2323_v28  ;;  %v2327_v5 = vpop.eup %2326 }
 0x4bd   : > { %1756 = vadd.xlane.f32.xlu1 %v1755_v42  ;;  %v2329_v17 = vpop.eup %2328  ;;  %v986_v44 = vpop.xlane.xlu0 %985 }
 0x4be   : > { %v2331_v54 = vpop.eup %2330  ;;  %2340 = vrcp.f32 %v986_v44  ;;  %1898 = vmatprep.mubr.f32.mxu1 %v2329_v17  ;;  %v1758_v55 = vadd.f32 %v2329_v17, %v2327_v5 }
 0x4bf   : > { %v1200_v20 = vmul.f32 %v2331_v54, %v2850_v4 }
 0x4c0   : > { %1899 = vmatmul.mubr.f32.gmra.mrb[68].mxu1 %v2327_v5 }
 0x4c1   : > { %v2333_v39 = vpop.eup %2332  ;;  %1759 = vadd.xlane.f32.xlu1 %v1758_v55  ;;  %1216 = vxpose.xlu0.b32.start [1/16] (narrow) %v1200_v20, 32  ;;  %v989_v25 = vpop.xlane.xlu0 %988 }
 0x4c2   : > { %v2335_v58 = vpop.eup %2334  ;;  %2342 = vrcp.f32 %v989_v25  ;;  %v2399_v25 = vld [vmem:[%s2482_s10 + $0x10] sm:$0xff] }
 0x4c3   : > { %v2337_v0 = vpop.eup %2336  ;;  %1903 = vmatprep.mubr.f32.mxu1 %v2335_v58  ;;  %v1761_v29 = vadd.f32 %v2335_v58, %v2333_v39 }
 0x4c4   : > { %1904 = vmatmul.mubr.f32.gmra.mrb[70].mxu1 %v2333_v39  ;;  %v1201_v27 = vmul.f32 %v2337_v0, %v2852_v32  ;;  %v2339_v33 = vpop.eup %2338 }
 0x4c5   : > { %1762 = vadd.xlane.f32.xlu1 %v1761_v29  ;;  %v992_v45 = vpop.xlane.xlu0 %991  ;;  %v1202_v34 = vmul.f32 %v2339_v33, %v2974_v51 }
 0x4c6   : > { %1217 = vxpose.xlu0.b32.cont [2/16] (narrow) %v1201_v27, 32  ;;  %2344 = vrcp.f32 %v992_v45 }
 0x4c8   : > { %v2341_v4 = vpop.eup %2340 }
 0x4c9   : > { %v995_v53 = vpop.xlane.xlu0 %994  ;;  %v1203_v16 = vmul.f32 %v2341_v4, %v2976_v47 }
 0x4ca   : > { %1218 = vxpose.xlu0.b32.cont [3/16] (narrow) %v1202_v34, 32  ;;  %2346 = vrcp.f32 %v995_v53  ;;  %v2400_v53 = vld [vmem:[%s2482_s10 + $0x20] sm:$0xff] }
 0x4cc   : > { %v2343_v22 = vpop.eup %2342 }
 0x4cd   : > { %v998_v19 = vpop.xlane.xlu0 %997  ;;  %v1204_v56 = vmul.f32 %v2343_v22, %v2978_v6 }
 0x4ce   : > { %1219 = vxpose.xlu0.b32.cont [4/16] (narrow) %v1203_v16, 32  ;;  %2348 = vrcp.f32 %v998_v19 }
 0x4d0   : > { %v2345_v32 = vpop.eup %2344 }
 0x4d1   : > { %v1001_v12 = vpop.xlane.xlu0 %1000  ;;  %v1205_v31 = vmul.f32 %v2345_v32, %v2980_v18 }
 0x4d2   : > { %1220 = vxpose.xlu0.b32.cont [5/16] (narrow) %v1204_v56, 32  ;;  %2350 = vrcp.f32 %v1001_v12 }
 0x4d4   : > { %v2347_v51 = vpop.eup %2346 }
 0x4d5   : > { %v1004_v3 = vpop.xlane.xlu0 %1003  ;;  %v1206_v40 = vmul.f32 %v2347_v51, %v2982_v61 }
 0x4d6   : > { %1221 = vxpose.xlu0.b32.cont [6/16] (narrow) %v1205_v31, 32  ;;  %2352 = vrcp.f32 %v1004_v3  ;;  %v2401_v31 = vld [vmem:[%s2482_s10 + $0x30] sm:$0xff] }
 0x4d8   : > { %v2349_v47 = vpop.eup %2348 }
 0x4d9   : > { %v1007_v62 = vpop.xlane.xlu0 %1006  ;;  %v1207_v9 = vmul.f32 %v2349_v47, %v2986_v59 }
 0x4da   : > { %1222 = vxpose.xlu0.b32.cont [7/16] (narrow) %v1206_v40, 32  ;;  %2354 = vrcp.f32 %v1007_v62 }
 0x4dc   : > { %v2351_v6 = vpop.eup %2350 }
 0x4dd   : > { %v1010_v14 = vpop.xlane.xlu0 %1009  ;;  %v1208_v60 = vmul.f32 %v2351_v6, %v2990_v35 }
 0x4de   : > { %1223 = vxpose.xlu0.b32.cont [8/16] (narrow) %v1207_v9, 32  ;;  %2356 = vrcp.f32 %v1010_v14 }
 0x4e0   : > { %v2353_v18 = vpop.eup %2352 }
 0x4e1   : > { %v1013_v1 = vpop.xlane.xlu0 %1012  ;;  %v1209_v37 = vmul.f32 %v2353_v18, %v2994_v2 }
 0x4e2   : > { %1224 = vxpose.xlu0.b32.cont [9/16] (narrow) %v1208_v60, 32  ;;  %2358 = vrcp.f32 %v1013_v1 }
 0x4e4   : > { %v2355_v61 = vpop.eup %2354 }
 0x4e5   : > { %v1016_v50 = vpop.xlane.xlu0 %1015  ;;  %v1210_v8 = vmul.f32 %v2355_v61, %v2998_v38 }
 0x4e6   : > { %1225 = vxpose.xlu0.b32.cont [10/16] (narrow) %v1209_v37, 32  ;;  %2360 = vrcp.f32 %v1016_v50 }
 0x4e8   : > { %v2357_v59 = vpop.eup %2356 }
 0x4e9   : > { %v1019_v10 = vpop.xlane.xlu0 %1018  ;;  %v1211_v63 = vmul.f32 %v2357_v59, %v3002_v41 }
 0x4ea   : > { %1226 = vxpose.xlu0.b32.cont [11/16] (narrow) %v1210_v8, 32  ;;  %2362 = vrcp.f32 %v1019_v10 }
 0x4ec   : > { %v2359_v35 = vpop.eup %2358 }
 0x4ed   : > { %v1022_v30 = vpop.xlane.xlu0 %1021  ;;  %v1212_v36 = vmul.f32 %v2359_v35, %v3006_v48 }
 0x4ee   : > { %1227 = vxpose.xlu0.b32.cont [12/16] (narrow) %v1211_v63, 32  ;;  %2364 = vrcp.f32 %v1022_v30 }
 0x4f0   : > { %v2361_v2 = vpop.eup %2360 }
 0x4f1   : > { %v1213_v46 = vmul.f32 %v2361_v2, %v3010_v52 }
 0x4f2   : > { %1228 = vxpose.xlu0.b32.cont [13/16] (narrow) %v1212_v36, 32 }
 0x4f4   : > { %v2363_v38 = vpop.eup %2362 }
 0x4f5   : > { %v1214_v43 = vmul.f32 %v2363_v38, %v3014_v26 }
 0x4f6   : > { %1229 = vxpose.xlu0.b32.cont [14/16] (narrow) %v1213_v46, 32 }
 0x4f8   : > { %v2365_v15 = vpop.eup %2364 }
 0x4f9   : > { %v1215_v41 = vmul.f32 %v2365_v15, %v3018_v11 }
 0x4fa   : > { %1230 = vxpose.xlu0.b32.cont [15/16] (narrow) %v1214_v43, 32 }
 0x4fe   : > { %1231 = vxpose.xlu0.b32.end [16/16] (narrow) %v1215_v41, 32 }
 0x515   : > { %v1718_v7 = vpop.xlane.xlu1 %1717 }
 0x516   : > { %2366 = vrcp.f32 %v1718_v7 }
 0x519   : > { %v1721_v49 = vpop.xlane.xlu1 %1720 }
 0x51a   : > { %2368 = vrcp.f32 %v1721_v49 }
 0x51d   : > { %v1724_v13 = vpop.xlane.xlu1 %1723 }
 0x51e   : > { %2370 = vrcp.f32 %v1724_v13 }
 0x520   : > { %v2367_v23 = vpop.eup %2366 }
 0x521   : > { %v1727_v48 = vpop.xlane.xlu1 %1726 }
 0x522   : > { %2372 = vrcp.f32 %v1727_v48 }
 0x524   : > { %v2369_v44 = vpop.eup %2368 }
 0x526   : > { %v1730_v26 = vpop.xlane.xlu1 %1729 }
 0x527   : > { %2374 = vrcp.f32 %v1730_v26 }
 0x528   : > { %v2371_v29 = vpop.eup %2370 }
 0x52a   : > { %v1733_v28 = vpop.xlane.xlu1 %1732 }
 0x52b   : > { %2376 = vrcp.f32 %v1733_v28 }
 0x52c   : > { %v2373_v22 = vpop.eup %2372 }
 0x52e   : > { %v1736_v11 = vpop.xlane.xlu1 %1735 }
 0x52f   : > { %2378 = vrcp.f32 %v1736_v11 }
 0x531   : > { %v2375_v3 = vpop.eup %2374 }
 0x532   : > { %v1739_v21 = vpop.xlane.xlu1 %1738 }
 0x533   : > { %2380 = vrcp.f32 %v1739_v21 }
 0x535   : > { %v2377_v6 = vpop.eup %2376 }
 0x536   : > { %v1742_v55 = vpop.xlane.xlu1 %1741 }
 0x537   : > { %2382 = vrcp.f32 %v1742_v55 }
 0x539   : > { %v2379_v37 = vpop.eup %2378 }
 0x53a   : > { %v1745_v4 = vpop.xlane.xlu1 %1744 }
 0x53b   : > { %2384 = vrcp.f32 %v1745_v4 }
 0x53d   : > { %v2381_v59 = vpop.eup %2380 }
 0x53e   : > { %v1748_v47 = vpop.xlane.xlu1 %1747 }
 0x53f   : > { %2386 = vrcp.f32 %v1748_v47 }
 0x541   : > { %v2383_v36 = vpop.eup %2382 }
 0x542   : > { %v1232_v52 = vpop.trf.xlu0  ;;  %v1751_v1 = vpop.xlane.xlu1 %1750 }
 0x543   : > { %v1248_v24 = vadd.f32 %v2398_v57, %v1232_v52  ;;  %2388 = vrcp.f32 %v1751_v1 }
 0x545   : > { %1252 = vst [vmem:[%s3055_s14] sm:$0xff] %v1248_v24  ;;  %v2385_v15 = vpop.eup %2384 }
 0x546   : > { %v1233_v58 = vpop.trf.xlu0  ;;  %v1754_v63 = vpop.xlane.xlu1 %1753 }
 0x547   : > { %v1249_v0 = vadd.f32 %v2399_v25, %v1233_v58  ;;  %2390 = vrcp.f32 %v1754_v63 }
 0x549   : > { %1253 = vst [vmem:[%s3055_s14 + $0x10] sm:$0xff] %v1249_v0  ;;  %v2387_v13 = vpop.eup %2386 }
 0x54a   : > { %v1234_v34 = vpop.trf.xlu0  ;;  %v1757_v43 = vpop.xlane.xlu1 %1756 }
 0x54b   : > { %v1250_v16 = vadd.f32 %v2400_v53, %v1234_v34  ;;  %2392 = vrcp.f32 %v1757_v43  ;;  %v2402_v53 = vld [vmem:[%s2482_s10 + $0x8] sm:$0xff] }
 0x54d   : > { %1254 = vst [vmem:[%s3055_s14 + $0x20] sm:$0xff] %v1250_v16  ;;  %v2389_v26 = vpop.eup %2388 }
 0x54e   : > { %v1235_v12 = vpop.trf.xlu0  ;;  %v1760_v52 = vpop.xlane.xlu1 %1759 }
 0x54f   : > { %v1251_v51 = vadd.f32 %v2401_v31, %v1235_v12  ;;  %2394 = vrcp.f32 %v1760_v52  ;;  %v2404_v12 = vld [vmem:[%s2482_s10 + $0x28] sm:$0xff] }
 0x551   : > { %1255 = vst [vmem:[%s3055_s14 + $0x30] sm:$0xff] %v1251_v51 }
 0x55a   : > { %v1830_v42 = vpop.f32.mrb[40].mxu1 }
 0x55b   : > { %v1941_v5 = vmul.f32 %v2367_v23, %v1830_v42  ;;  %v1832_v17 = vpop.f32.mrb[41].mxu1  ;;  %v1763_v23 = vpop.xlane.xlu1 %1762 }
 0x55c   : > { %v2391_v42 = vpop.eup %2390  ;;  %2396 = vrcp.f32 %v1763_v23 }
 0x55d   : > { %1957 = vxpose.xlu1.b32.start [1/16] (narrow) %v1941_v5, 32 }
 0x55e   : > { %v1835_v54 = vpop.f32.mrb[42].mxu1 }
 0x55f   : > { %v1942_v20 = vmul.f32 %v2369_v44, %v1835_v54  ;;  %v1837_v39 = vpop.f32.mrb[43].mxu1  ;;  %v2393_v54 = vpop.eup %2392 }
 0x560   : > { %v2395_v58 = vpop.eup %2394 }
 0x561   : > { %1958 = vxpose.xlu1.b32.cont [2/16] (narrow) %v1942_v20, 32 }
 0x562   : > { %v1840_v27 = vpop.f32.mrb[44].mxu1 }
 0x563   : > { %v1943_v33 = vmul.f32 %v2371_v29, %v1840_v27  ;;  %v1842_v45 = vpop.f32.mrb[45].mxu1 }
 0x565   : > { %1959 = vxpose.xlu1.b32.cont [3/16] (narrow) %v1943_v33, 32 }
 0x566   : > { %v1845_v19 = vpop.f32.mrb[46].mxu1  ;;  %v2397_v27 = vpop.eup %2396 }
 0x567   : > { %v1944_v56 = vmul.f32 %v2373_v22, %v1845_v19  ;;  %v1847_v32 = vpop.f32.mrb[47].mxu1  ;;  %v2403_v19 = vld [vmem:[%s2482_s10 + $0x18] sm:$0xff] }
 0x569   : > { %1960 = vxpose.xlu1.b32.cont [4/16] (narrow) %v1944_v56, 32 }
 0x56b   : > { %v1850_v40 = vpop.f32.mrb[48].mxu1 }
 0x56c   : > { %v1945_v62 = vmul.f32 %v2375_v3, %v1850_v40  ;;  %v1852_v9 = vpop.f32.mrb[49].mxu1  ;;  %v2405_v3 = vld [vmem:[%s2482_s10 + $0x38] sm:$0xff] }
 0x56e   : > { %1961 = vxpose.xlu1.b32.cont [5/16] (narrow) %v1945_v62, 32 }
 0x56f   : > { %v1855_v14 = vpop.f32.mrb[50].mxu1 }
 0x570   : > { %v1946_v60 = vmul.f32 %v2377_v6, %v1855_v14  ;;  %v1857_v18 = vpop.f32.mrb[51].mxu1 }
 0x572   : > { %1962 = vxpose.xlu1.b32.cont [6/16] (narrow) %v1946_v60, 32 }
 0x573   : > { %v1860_v61 = vpop.f32.mrb[52].mxu1 }
 0x574   : > { %v1947_v50 = vmul.f32 %v2379_v37, %v1860_v61  ;;  %v1862_v8 = vpop.f32.mrb[53].mxu1 }
 0x576   : > { %1963 = vxpose.xlu1.b32.cont [7/16] (narrow) %v1947_v50, 32 }
 0x577   : > { %v1865_v10 = vpop.f32.mrb[54].mxu1 }
 0x578   : > { %v1948_v35 = vmul.f32 %v2381_v59, %v1865_v10  ;;  %v1867_v30 = vpop.f32.mrb[55].mxu1 }
 0x57a   : > { %1964 = vxpose.xlu1.b32.cont [8/16] (narrow) %v1948_v35, 32 }
 0x57b   : > { %v1870_v2 = vpop.f32.mrb[56].mxu1 }
 0x57c   : > { %v1949_v46 = vmul.f32 %v2383_v36, %v1870_v2  ;;  %v1872_v38 = vpop.f32.mrb[57].mxu1 }
 0x57e   : > { %1965 = vxpose.xlu1.b32.cont [9/16] (narrow) %v1949_v46, 32 }
 0x57f   : > { %v1875_v41 = vpop.f32.mrb[58].mxu1 }
 0x580   : > { %v1950_v7 = vmul.f32 %v2385_v15, %v1875_v41  ;;  %v1877_v49 = vpop.f32.mrb[59].mxu1 }
 0x582   : > { %1966 = vxpose.xlu1.b32.cont [10/16] (narrow) %v1950_v7, 32 }
 0x583   : > { %v1880_v48 = vpop.f32.mrb[60].mxu1 }
 0x584   : > { %v1951_v57 = vmul.f32 %v2387_v13, %v1880_v48  ;;  %v1882_v24 = vpop.f32.mrb[61].mxu1 }
 0x586   : > { %1967 = vxpose.xlu1.b32.cont [11/16] (narrow) %v1951_v57, 32 }
 0x587   : > { %v1885_v28 = vpop.f32.mrb[62].mxu1 }
 0x588   : > { %v1952_v11 = vmul.f32 %v2389_v26, %v1885_v28  ;;  %v1887_v21 = vpop.f32.mrb[63].mxu1 }
 0x58a   : > { %1968 = vxpose.xlu1.b32.cont [12/16] (narrow) %v1952_v11, 32 }
 0x58b   : > { %v1890_v5 = vpop.f32.mrb[64].mxu1 }
 0x58c   : > { %v1953_v17 = vmul.f32 %v2391_v42, %v1890_v5  ;;  %v1892_v44 = vpop.f32.mrb[65].mxu1 }
 0x58e   : > { %1969 = vxpose.xlu1.b32.cont [13/16] (narrow) %v1953_v17, 32 }
 0x58f   : > { %v1895_v55 = vpop.f32.mrb[66].mxu1 }
 0x590   : > { %v1954_v20 = vmul.f32 %v2393_v54, %v1895_v55  ;;  %v1897_v39 = vpop.f32.mrb[67].mxu1 }
 0x592   : > { %1970 = vxpose.xlu1.b32.cont [14/16] (narrow) %v1954_v20, 32 }
 0x593   : > { %v1900_v25 = vpop.f32.mrb[68].mxu1 }
 0x594   : > { %v1955_v0 = vmul.f32 %v2395_v58, %v1900_v25  ;;  %v1902_v29 = vpop.f32.mrb[69].mxu1 }
 0x596   : > { %1971 = vxpose.xlu1.b32.cont [15/16] (narrow) %v1955_v0, 32 }
 0x597   : > { %v1905_v33 = vpop.f32.mrb[70].mxu1 }
 0x598   : > { %v1956_v45 = vmul.f32 %v2397_v27, %v1905_v33  ;;  %v1907_v34 = vpop.f32.mrb[71].mxu1 }
 0x59a   : > { %1972 = vxpose.xlu1.b32.end [16/16] (narrow) %v1956_v45, 32 }
 0x5de   : > { %v1973_v4 = vpop.trf.xlu1 }
 0x5df   : > { %v1989_v16 = vadd.f32 %v2402_v53, %v1973_v4 }
 0x5e1   : > { %2109 = vst [vmem:[%s3055_s14 + $0x8] sm:$0xff] %v1989_v16 }
 0x5e2   : > { %v1974_v22 = vpop.trf.xlu1 }
 0x5e3   : > { %v1990_v56 = vadd.f32 %v2403_v19, %v1974_v22 }
 0x5e5   : > { %2110 = vst [vmem:[%s3055_s14 + $0x18] sm:$0xff] %v1990_v56 }
 0x5e6   : > { %v1975_v32 = vpop.trf.xlu1 }
 0x5e7   : > { %v1991_v31 = vadd.f32 %v2404_v12, %v1975_v32 }
 0x5e9   : > { %2111 = vst [vmem:[%s3055_s14 + $0x28] sm:$0xff] %v1991_v31 }
 0x5ea   : > { %v1976_v51 = vpop.trf.xlu1 }
 0x5eb   : > { %v1992_v40 = vadd.f32 %v2405_v3, %v1976_v51 }
 0x5ed   : > { %2112 = vst [vmem:[%s3055_s14 + $0x38] sm:$0xff] %v1992_v40 }
 0x5ee PF: > { %s17_s24 = sadd.s32 1, %s2412_s24  }
 0x5ef   : > { %p14_p4 = scmp.ge.s32.totalorder %s17_s24, 4  }
 0x5f1   :  { %16 = sbr.rel (!%p14_p4) target bundleno = 1 (0x1), region = 80 }

</bundles_post_ra>
